<compile_context>
chip_gen: v7x
topology: tpu7x:2x2x1
jax: 0.10.0
libtpu: 0.0.40
codegen_flags: <defaults>
</compile_context>

<pallas_src>
import functools

import jax
import jax.numpy as jnp
from jax import lax
from jax.experimental import pallas as pl
from jax.experimental.pallas import tpu as pltpu


def _round_up(x, m):
    return (x + m - 1) // m * m


# ---------------------------------------------------------------------------
# Fused Pallas kernel: up-conv + (concat) + conv1 + ReLU + conv2 + ReLU
# ---------------------------------------------------------------------------

def _upconv_block_kernel(xd_ref, dn_ref, wA_ref, bA_ref, w1d_ref, w1u_ref,
                         b1_ref, w2_ref, b2_ref, m_ref, o_ref,
                         upad_ref, ypad_ref, *, Wd, Nq):
    """One image of UpConvBlock.

    xd_ref : (1, Cin,  L)  bf16  dilated+padded ConvTranspose input, flattened
    dn_ref : (1, Cout, L)  bf16  spatially padded skip tensor, flattened
    wA_ref : (9, Cout, Cin)   bf16  up-conv taps (flipped, in/out swapped)
    w1d/w1u: (9, Cout, Cout)  bf16  conv1 taps for the down / up channel halves
    w2_ref : (9, Cout, Cout)  bf16  conv2 taps
    bA/b1/b2: (Cout, 1) f32 biases
    m_ref  : (1, Nq) f32   1.0 on valid flattened columns (q % Wd < W_out)
    o_ref  : (1, Cout, Nq) f32 output (still in padded-width flattened coords)
    upad_ref, ypad_ref: (Cout, L) bf16 VMEM scratch (padded intermediates)

    Flattened-conv trick: with padded width Wd, output position q = h*Wd + w
    (w < W_out) is   sum_taps W_tap @ x_flat[:, q + dy*Wd + dx];  the two
    wrap-around columns per row are garbage and get masked to zero before the
    result is re-padded for the next conv.
    """
    cout = o_ref.shape[1]
    mask = m_ref[...]                                   # (1, Nq) f32

    def conv9(w_ref, slab_fn):
        acc = jnp.zeros((cout, Nq), jnp.float32)
        for t in range(9):                              # unrolled: 9 MXU matmuls
            acc = acc + jnp.dot(w_ref[t], slab_fn(t),
                                preferred_element_type=jnp.float32)
        return acc

    def in_slab(ref3):                                  # (1, C, L) input ref
        def f(t):
            s = (t // 3) * Wd + (t % 3)
            return ref3[0, :, s:s + Nq]
        return f

    def pad_slab(ref2):                                 # (C, L) scratch ref
        def f(t):
            s = (t // 3) * Wd + (t % 3)
            return ref2[:, s:s + Nq]
        return f

    def store_padded(ref2, val):
        # zero border + interior write => valid padded layout for the next conv
        ref2[...] = jnp.zeros_like(ref2)
        ref2[:, Wd + 1:Wd + 1 + Nq] = val.astype(ref2.dtype)

    # --- up_conv: ConvTranspose2d(k=3, s=2) + bias (dropout = identity) ------
    up = conv9(wA_ref, in_slab(xd_ref)) + bA_ref[...]
    store_padded(upad_ref, up * mask)

    # --- conv1 over concat([down_tensor, up]) + ReLU (concat fused away) -----
    acc1 = conv9(w1d_ref, in_slab(dn_ref)) + conv9(w1u_ref, pad_slab(upad_ref))
    y1 = jnp.maximum(acc1 + b1_ref[...], 0.0)
    store_padded(ypad_ref, y1 * mask)

    # --- conv2 + ReLU ---------------------------------------------------------
    acc2 = conv9(w2_ref, pad_slab(ypad_ref))
    o_ref[0] = jnp.maximum(acc2 + b2_ref[...], 0.0).astype(o_ref.dtype)


# ---------------------------------------------------------------------------
# Wrapper: layout glue (dilate / pad / flatten / weight repack) + pallas_call
# ---------------------------------------------------------------------------

def up_conv_block_forward(x, down_tensor, params, output_size=None):
    """x: (N, Cin, H, W); down_tensor: (N, Cout, H_out, W_out).  NCHW, f32.

    params = (w_up, b_up, w1, b1, w2, b2) with PyTorch layouts:
       w_up: (Cin, Cout, 3, 3)  ConvTranspose2d weight
       w1:   (Cout, 2*Cout, 3, 3), w2: (Cout, Cout, 3, 3)  Conv2d weights
    """
    w_up, b_up, w1, b1, w2, b2 = params
    n, cin, h, w = x.shape
    cout = w_up.shape[1]
    stride, ksz = 2, 3

    # PyTorch ConvTranspose2d output_size -> output_padding
    if output_size is None:
        op_h = op_w = 0
    else:
        th, tw = int(output_size[-2]), int(output_size[-1])
        op_h = th - ((h - 1) * stride + ksz)
        op_w = tw - ((w - 1) * stride + ksz)
        assert 0 <= op_h < stride and 0 <= op_w < stride, "invalid output_size"
    h_out = (h - 1) * stride + ksz + op_h
    w_out = (w - 1) * stride + ksz + op_w
    assert down_tensor.shape == (n, cout, h_out, w_out), (
        f"tensors of different shapes on upsample: down => {down_tensor.shape} "
        f"vs up => {(n, cout, h_out, w_out)}")

    hd, wd = h_out + 2, w_out + 2        # conv(pad=1)-padded spatial dims
    nq = h_out * wd                      # flattened accumulation length
    L = _round_up(hd * wd + 2, 128)      # lane-padded flat length (tap overshoot <= 2)

    # ---- layout glue (cheap, ~1x data; no 9x im2col blow-up) ----------------
    # ConvTranspose input: stride-dilate + pad (lo=2, hi=2+output_padding).
    xdp = lax.pad(x, jnp.float32(0),
                  ((0, 0, 0), (0, 0, 0), (2, 2 + op_h, 1), (2, 2 + op_w, 1)))
    xdp = jnp.pad(xdp.reshape(n, cin, hd * wd),
                  ((0, 0), (0, 0), (0, L - hd * wd))).astype(jnp.bfloat16)

    # Skip tensor: pad=1 spatially, flatten.
    dpad = jnp.pad(down_tensor, ((0, 0), (0, 0), (1, 1), (1, 1)))
    dpad = jnp.pad(dpad.reshape(n, cout, hd * wd),
                   ((0, 0), (0, 0), (0, L - hd * wd))).astype(jnp.bfloat16)

    # Validity mask over flattened index q = h*wd + w  (keep w < w_out).
    mask = ((jnp.arange(nq, dtype=jnp.int32) % wd) < w_out)
    mask = mask.astype(jnp.float32).reshape(1, nq)

    # ---- weights: tap-major (9, Cout, C), bf16 for the MXU ------------------
    # ConvTranspose2d == conv over the dilated input with flipped, swapped kernel.
    wA = jnp.transpose(w_up[:, :, ::-1, ::-1], (2, 3, 1, 0))
    wA = wA.reshape(9, cout, cin).astype(jnp.bfloat16)
    # conv1 weight split into the [down | up] channel halves (fuses the concat).
    w1d = jnp.transpose(w1[:, :cout], (2, 3, 0, 1)).reshape(9, cout, cout).astype(jnp.bfloat16)
    w1u = jnp.transpose(w1[:, cout:], (2, 3, 0, 1)).reshape(9, cout, cout).astype(jnp.bfloat16)
    w2t = jnp.transpose(w2, (2, 3, 0, 1)).reshape(9, cout, cout).astype(jnp.bfloat16)
    bA = b_up.reshape(cout, 1).astype(jnp.float32)
    b1r = b1.reshape(cout, 1).astype(jnp.float32)
    b2r = b2.reshape(cout, 1).astype(jnp.float32)

    kernel = functools.partial(_upconv_block_kernel, Wd=wd, Nq=nq)
    rep3 = lambda i: (0, 0, 0)
    rep2 = lambda i: (0, 0)

    out_flat = pl.pallas_call(
        kernel,
        out_shape=jax.ShapeDtypeStruct((n, cout, nq), jnp.float32),
        grid=(n,),
        in_specs=[
            pl.BlockSpec((1, cin, L), lambda i: (i, 0, 0)),   # dilated x
            pl.BlockSpec((1, cout, L), lambda i: (i, 0, 0)),  # padded skip
            pl.BlockSpec((9, cout, cin), rep3),               # wA
            pl.BlockSpec((cout, 1), rep2),                    # bA
            pl.BlockSpec((9, cout, cout), rep3),              # w1 (down half)
            pl.BlockSpec((9, cout, cout), rep3),              # w1 (up half)
            pl.BlockSpec((cout, 1), rep2),                    # b1
            pl.BlockSpec((9, cout, cout), rep3),              # w2
            pl.BlockSpec((cout, 1), rep2),                    # b2
            pl.BlockSpec((1, nq), rep2),                      # column mask
        ],
        out_specs=pl.BlockSpec((1, cout, nq), lambda i: (i, 0, 0)),
        scratch_shapes=[pltpu.VMEM((cout, L), jnp.bfloat16),   # padded up-conv
                        pltpu.VMEM((cout, L), jnp.bfloat16)],  # padded conv1 out
        compiler_params=pltpu.CompilerParams(
            dimension_semantics=("parallel",)),
    )(xdp, dpad, wA, bA, w1d, w1u, b1r, w2t, b2r, mask)

    # Drop the 2 wrap columns of the flattened layout: q = h*wd + w, keep w < w_out.
    return out_flat.reshape(n, cout, h_out, wd)[:, :, :, :w_out]


# ---------------------------------------------------------------------------
# Pure-JAX reference (independent formulation, f32)
# ---------------------------------------------------------------------------

def _ref_conv_relu(x, w, b):
    y = lax.conv_general_dilated(x, w, (1, 1), ((1, 1), (1, 1)),
                                 dimension_numbers=("NCHW", "OIHW", "NCHW"))
    return jnp.maximum(y + b[None, :, None, None], 0.0)


def up_conv_block_reference(x, down_tensor, params):
    w_up, b_up, w1, b1, w2, b2 = params
    n, cin, h, w = x.shape
    cout = w_up.shape[1]
    h_out, w_out = down_tensor.shape[-2], down_tensor.shape[-1]
    # ConvTranspose2d(k=3, s=2, p=0) as an explicit scatter-add.
    up = jnp.zeros((n, cout, h_out, w_out), jnp.float32)
    for kh in range(3):
        for kw in range(3):
            contrib = jnp.einsum('nchw,cd->ndhw', x, w_up[:, :, kh, kw])
            up = up.at[:, :, kh:kh + 2 * h:2, kw:kw + 2 * w:2].add(contrib)
    up = up + b_up[None, :, None, None]
    cat = jnp.concatenate([down_tensor, up], axis=1)
    y = _ref_conv_relu(cat, w1, b1)
    return _ref_conv_relu(y, w2, b2)


# ---------------------------------------------------------------------------

def make_params(key, in_channels, out_channels):
    k = jax.random.split(key, 6)
    s_up = 1.0 / (9.0 * in_channels) ** 0.5
    s1 = 1.0 / (9.0 * 2 * out_channels) ** 0.5
    s2 = 1.0 / (9.0 * out_channels) ** 0.5
    w_up = jax.random.normal(k[0], (in_channels, out_channels, 3, 3), jnp.float32) * s_up
    b_up = jax.random.normal(k[1], (out_channels,), jnp.float32) * 0.02
    w1 = jax.random.normal(k[2], (out_channels, 2 * out_channels, 3, 3), jnp.float32) * s1
    b1 = jax.random.normal(k[3], (out_channels,), jnp.float32) * 0.02
    w2 = jax.random.normal(k[4], (out_channels, out_channels, 3, 3), jnp.float32) * s2
    b2 = jax.random.normal(k[5], (out_channels,), jnp.float32) * 0.02
    return (w_up, b_up, w1, b1, w2, b2)


if __name__ == "__main__":
    in_channels, out_channels = 16, 8
    N, H, W = 2, 8, 8

    key = jax.random.PRNGKey(0)
    kx, kd, kp = jax.random.split(key, 3)

    # PyTorch NCHW layout.
    x = jax.random.normal(kx, (N, in_channels, H, W), jnp.float32)
    # Skip tensor at the up-sampled resolution (output_padding = 1 branch).
    H_out = W_out = 2 * H + 2
    down_tensor = jnp.maximum(
        jax.random.normal(kd, (N, out_channels, H_out, W_out), jnp.float32), 0.0)
    params = make_params(kp, in_channels, out_channels)

    fwd = jax.jit(up_conv_block_forward, static_argnames=("output_size",))
    out = fwd(x, down_tensor, params, output_size=down_tensor.shape)
    out = jax.block_until_ready(out)

    ref = up_conv_block_reference(x, down_tensor, params)
    assert out.shape == ref.shape == (N, out_channels, H_out, W_out)
    err = float(jnp.max(jnp.abs(out - ref)))
    scale = float(jnp.max(jnp.abs(ref)))
    # bf16 MXU matmuls vs f32 reference -> relaxed tolerance.
    assert err <= 5e-2 * max(scale, 1.0), (err, scale)

    print("KERNEL_OK")
</pallas_src>

<mosaic_0001>
module attributes {stable_mosaic.version = 11 : i64} {
  func.func @_upconv_block_kernel(%arg0: i32, %arg1: memref<1x16x512xbf16, #tpu.memory_space<vmem>>, %arg2: memref<1x8x512xbf16, #tpu.memory_space<vmem>>, %arg3: memref<9x8x16xbf16, #tpu.memory_space<vmem>>, %arg4: memref<8x1xf32, #tpu.memory_space<vmem>>, %arg5: memref<9x8x8xbf16, #tpu.memory_space<vmem>>, %arg6: memref<9x8x8xbf16, #tpu.memory_space<vmem>>, %arg7: memref<8x1xf32, #tpu.memory_space<vmem>>, %arg8: memref<9x8x8xbf16, #tpu.memory_space<vmem>>, %arg9: memref<8x1xf32, #tpu.memory_space<vmem>>, %arg10: memref<1x360xf32, #tpu.memory_space<vmem>>, %arg11: memref<1x8x360xf32, #tpu.memory_space<vmem>>, %arg12: memref<8x512xbf16, #tpu.memory_space<vmem>>, %arg13: memref<8x512xbf16, #tpu.memory_space<vmem>>) attributes {dimension_semantics = [#tpu.dimension_semantics<parallel>], iteration_bounds = array<i64: 2>, scalar_prefetch = 0 : i64, scratch_operands = 2 : i64, tpu.core_type = #tpu.core_type<tc>, window_params = [{transform_indices = @transform_0, window_bounds = array<i64: 1, 16, 512>}, {transform_indices = @transform_1, window_bounds = array<i64: 1, 8, 512>}, {pipeline_mode = #tpu.pipeline_mode<synchronous>, transform_indices = @transform_2, window_bounds = array<i64: 9, 8, 16>}, {pipeline_mode = #tpu.pipeline_mode<synchronous>, transform_indices = @transform_3, window_bounds = array<i64: 8, 1>}, {pipeline_mode = #tpu.pipeline_mode<synchronous>, transform_indices = @transform_4, window_bounds = array<i64: 9, 8, 8>}, {pipeline_mode = #tpu.pipeline_mode<synchronous>, transform_indices = @transform_5, window_bounds = array<i64: 9, 8, 8>}, {pipeline_mode = #tpu.pipeline_mode<synchronous>, transform_indices = @transform_6, window_bounds = array<i64: 8, 1>}, {pipeline_mode = #tpu.pipeline_mode<synchronous>, transform_indices = @transform_7, window_bounds = array<i64: 9, 8, 8>}, {pipeline_mode = #tpu.pipeline_mode<synchronous>, transform_indices = @transform_8, window_bounds = array<i64: 8, 1>}, {pipeline_mode = #tpu.pipeline_mode<synchronous>, transform_indices = @transform_9, window_bounds = array<i64: 1, 360>}, {transform_indices = @transform_10, window_bounds = array<i64: 1, 8, 360>}]} {
    %c0 = arith.constant 0 : index
    %c0_0 = arith.constant 0 : index
    %0 = vector.load %arg10[%c0, %c0_0] : memref<1x360xf32, #tpu.memory_space<vmem>>, vector<1x360xf32>
    %cst = arith.constant 0.000000e+00 : f32
    %1 = vector.broadcast %cst : f32 to vector<8x360xf32>
    %c0_1 = arith.constant 0 : index
    %c0_2 = arith.constant 0 : index
    %c0_3 = arith.constant 0 : index
    %2 = vector.load %arg3[%c0_1, %c0_2, %c0_3] : memref<9x8x16xbf16, #tpu.memory_space<vmem>>, vector<1x8x16xbf16>
    %3 = vector.shape_cast %2 : vector<1x8x16xbf16> to vector<8x16xbf16>
    %c0_4 = arith.constant 0 : index
    %c0_5 = arith.constant 0 : index
    %c0_6 = arith.constant 0 : index
    %4 = vector.load %arg1[%c0_4, %c0_5, %c0_6] : memref<1x16x512xbf16, #tpu.memory_space<vmem>>, vector<1x16x360xbf16>
    %5 = vector.shape_cast %4 : vector<1x16x360xbf16> to vector<16x360xbf16>
    %cst_7 = arith.constant dense<0.000000e+00> : vector<8x360xf32>
    %6 = tpu.matmul %3, %5, %cst_7 {dimension_numbers = #tpu.dot_dimension_numbers<[1], [0], [0], [1], [0, 0, 1, 1], [], []>} : vector<8x16xbf16>, vector<16x360xbf16>, vector<8x360xf32> -> vector<8x360xf32>
    %7 = arith.addf %1, %6 : vector<8x360xf32>
    %c1 = arith.constant 1 : index
    %c0_8 = arith.constant 0 : index
    %c0_9 = arith.constant 0 : index
    %8 = vector.load %arg3[%c1, %c0_8, %c0_9] : memref<9x8x16xbf16, #tpu.memory_space<vmem>>, vector<1x8x16xbf16>
    %9 = vector.shape_cast %8 : vector<1x8x16xbf16> to vector<8x16xbf16>
    %c0_10 = arith.constant 0 : index
    %c0_11 = arith.constant 0 : index
    %c1_12 = arith.constant 1 : index
    %10 = vector.load %arg1[%c0_10, %c0_11, %c1_12] : memref<1x16x512xbf16, #tpu.memory_space<vmem>>, vector<1x16x360xbf16>
    %11 = vector.shape_cast %10 : vector<1x16x360xbf16> to vector<16x360xbf16>
    %cst_13 = arith.constant dense<0.000000e+00> : vector<8x360xf32>
    %12 = tpu.matmul %9, %11, %cst_13 {dimension_numbers = #tpu.dot_dimension_numbers<[1], [0], [0], [1], [0, 0, 1, 1], [], []>} : vector<8x16xbf16>, vector<16x360xbf16>, vector<8x360xf32> -> vector<8x360xf32>
    %13 = arith.addf %7, %12 : vector<8x360xf32>
    %c2 = arith.constant 2 : index
    %c0_14 = arith.constant 0 : index
    %c0_15 = arith.constant 0 : index
    %14 = vector.load %arg3[%c2, %c0_14, %c0_15] : memref<9x8x16xbf16, #tpu.memory_space<vmem>>, vector<1x8x16xbf16>
    %15 = vector.shape_cast %14 : vector<1x8x16xbf16> to vector<8x16xbf16>
    %c0_16 = arith.constant 0 : index
    %c0_17 = arith.constant 0 : index
    %c2_18 = arith.constant 2 : index
    %16 = vector.load %arg1[%c0_16, %c0_17, %c2_18] : memref<1x16x512xbf16, #tpu.memory_space<vmem>>, vector<1x16x360xbf16>
    %17 = vector.shape_cast %16 : vector<1x16x360xbf16> to vector<16x360xbf16>
    %cst_19 = arith.constant dense<0.000000e+00> : vector<8x360xf32>
    %18 = tpu.matmul %15, %17, %cst_19 {dimension_numbers = #tpu.dot_dimension_numbers<[1], [0], [0], [1], [0, 0, 1, 1], [], []>} : vector<8x16xbf16>, vector<16x360xbf16>, vector<8x360xf32> -> vector<8x360xf32>
    %19 = arith.addf %13, %18 : vector<8x360xf32>
    %c3 = arith.constant 3 : index
    %c0_20 = arith.constant 0 : index
    %c0_21 = arith.constant 0 : index
    %20 = vector.load %arg3[%c3, %c0_20, %c0_21] : memref<9x8x16xbf16, #tpu.memory_space<vmem>>, vector<1x8x16xbf16>
    %21 = vector.shape_cast %20 : vector<1x8x16xbf16> to vector<8x16xbf16>
    %c0_22 = arith.constant 0 : index
    %c0_23 = arith.constant 0 : index
    %c20 = arith.constant 20 : index
    %22 = vector.load %arg1[%c0_22, %c0_23, %c20] : memref<1x16x512xbf16, #tpu.memory_space<vmem>>, vector<1x16x360xbf16>
    %23 = vector.shape_cast %22 : vector<1x16x360xbf16> to vector<16x360xbf16>
    %cst_24 = arith.constant dense<0.000000e+00> : vector<8x360xf32>
    %24 = tpu.matmul %21, %23, %cst_24 {dimension_numbers = #tpu.dot_dimension_numbers<[1], [0], [0], [1], [0, 0, 1, 1], [], []>} : vector<8x16xbf16>, vector<16x360xbf16>, vector<8x360xf32> -> vector<8x360xf32>
    %25 = arith.addf %19, %24 : vector<8x360xf32>
    %c4 = arith.constant 4 : index
    %c0_25 = arith.constant 0 : index
    %c0_26 = arith.constant 0 : index
    %26 = vector.load %arg3[%c4, %c0_25, %c0_26] : memref<9x8x16xbf16, #tpu.memory_space<vmem>>, vector<1x8x16xbf16>
    %27 = vector.shape_cast %26 : vector<1x8x16xbf16> to vector<8x16xbf16>
    %c0_27 = arith.constant 0 : index
    %c0_28 = arith.constant 0 : index
    %c21 = arith.constant 21 : index
    %28 = vector.load %arg1[%c0_27, %c0_28, %c21] : memref<1x16x512xbf16, #tpu.memory_space<vmem>>, vector<1x16x360xbf16>
    %29 = vector.shape_cast %28 : vector<1x16x360xbf16> to vector<16x360xbf16>
    %cst_29 = arith.constant dense<0.000000e+00> : vector<8x360xf32>
    %30 = tpu.matmul %27, %29, %cst_29 {dimension_numbers = #tpu.dot_dimension_numbers<[1], [0], [0], [1], [0, 0, 1, 1], [], []>} : vector<8x16xbf16>, vector<16x360xbf16>, vector<8x360xf32> -> vector<8x360xf32>
    %31 = arith.addf %25, %30 : vector<8x360xf32>
    %c5 = arith.constant 5 : index
    %c0_30 = arith.constant 0 : index
    %c0_31 = arith.constant 0 : index
    %32 = vector.load %arg3[%c5, %c0_30, %c0_31] : memref<9x8x16xbf16, #tpu.memory_space<vmem>>, vector<1x8x16xbf16>
    %33 = vector.shape_cast %32 : vector<1x8x16xbf16> to vector<8x16xbf16>
    %c0_32 = arith.constant 0 : index
    %c0_33 = arith.constant 0 : index
    %c22 = arith.constant 22 : index
    %34 = vector.load %arg1[%c0_32, %c0_33, %c22] : memref<1x16x512xbf16, #tpu.memory_space<vmem>>, vector<1x16x360xbf16>
    %35 = vector.shape_cast %34 : vector<1x16x360xbf16> to vector<16x360xbf16>
    %cst_34 = arith.constant dense<0.000000e+00> : vector<8x360xf32>
    %36 = tpu.matmul %33, %35, %cst_34 {dimension_numbers = #tpu.dot_dimension_numbers<[1], [0], [0], [1], [0, 0, 1, 1], [], []>} : vector<8x16xbf16>, vector<16x360xbf16>, vector<8x360xf32> -> vector<8x360xf32>
    %37 = arith.addf %31, %36 : vector<8x360xf32>
    %c6 = arith.constant 6 : index
    %c0_35 = arith.constant 0 : index
    %c0_36 = arith.constant 0 : index
    %38 = vector.load %arg3[%c6, %c0_35, %c0_36] : memref<9x8x16xbf16, #tpu.memory_space<vmem>>, vector<1x8x16xbf16>
    %39 = vector.shape_cast %38 : vector<1x8x16xbf16> to vector<8x16xbf16>
    %c0_37 = arith.constant 0 : index
    %c0_38 = arith.constant 0 : index
    %c40 = arith.constant 40 : index
    %40 = vector.load %arg1[%c0_37, %c0_38, %c40] : memref<1x16x512xbf16, #tpu.memory_space<vmem>>, vector<1x16x360xbf16>
    %41 = vector.shape_cast %40 : vector<1x16x360xbf16> to vector<16x360xbf16>
    %cst_39 = arith.constant dense<0.000000e+00> : vector<8x360xf32>
    %42 = tpu.matmul %39, %41, %cst_39 {dimension_numbers = #tpu.dot_dimension_numbers<[1], [0], [0], [1], [0, 0, 1, 1], [], []>} : vector<8x16xbf16>, vector<16x360xbf16>, vector<8x360xf32> -> vector<8x360xf32>
    %43 = arith.addf %37, %42 : vector<8x360xf32>
    %c7 = arith.constant 7 : index
    %c0_40 = arith.constant 0 : index
    %c0_41 = arith.constant 0 : index
    %44 = vector.load %arg3[%c7, %c0_40, %c0_41] : memref<9x8x16xbf16, #tpu.memory_space<vmem>>, vector<1x8x16xbf16>
    %45 = vector.shape_cast %44 : vector<1x8x16xbf16> to vector<8x16xbf16>
    %c0_42 = arith.constant 0 : index
    %c0_43 = arith.constant 0 : index
    %c41 = arith.constant 41 : index
    %46 = vector.load %arg1[%c0_42, %c0_43, %c41] : memref<1x16x512xbf16, #tpu.memory_space<vmem>>, vector<1x16x360xbf16>
    %47 = vector.shape_cast %46 : vector<1x16x360xbf16> to vector<16x360xbf16>
    %cst_44 = arith.constant dense<0.000000e+00> : vector<8x360xf32>
    %48 = tpu.matmul %45, %47, %cst_44 {dimension_numbers = #tpu.dot_dimension_numbers<[1], [0], [0], [1], [0, 0, 1, 1], [], []>} : vector<8x16xbf16>, vector<16x360xbf16>, vector<8x360xf32> -> vector<8x360xf32>
    %49 = arith.addf %43, %48 : vector<8x360xf32>
    %c8 = arith.constant 8 : index
    %c0_45 = arith.constant 0 : index
    %c0_46 = arith.constant 0 : index
    %50 = vector.load %arg3[%c8, %c0_45, %c0_46] : memref<9x8x16xbf16, #tpu.memory_space<vmem>>, vector<1x8x16xbf16>
    %51 = vector.shape_cast %50 : vector<1x8x16xbf16> to vector<8x16xbf16>
    %c0_47 = arith.constant 0 : index
    %c0_48 = arith.constant 0 : index
    %c42 = arith.constant 42 : index
    %52 = vector.load %arg1[%c0_47, %c0_48, %c42] : memref<1x16x512xbf16, #tpu.memory_space<vmem>>, vector<1x16x360xbf16>
    %53 = vector.shape_cast %52 : vector<1x16x360xbf16> to vector<16x360xbf16>
    %cst_49 = arith.constant dense<0.000000e+00> : vector<8x360xf32>
    %54 = tpu.matmul %51, %53, %cst_49 {dimension_numbers = #tpu.dot_dimension_numbers<[1], [0], [0], [1], [0, 0, 1, 1], [], []>} : vector<8x16xbf16>, vector<16x360xbf16>, vector<8x360xf32> -> vector<8x360xf32>
    %55 = arith.addf %49, %54 : vector<8x360xf32>
    %c0_50 = arith.constant 0 : index
    %c0_51 = arith.constant 0 : index
    %56 = vector.load %arg4[%c0_50, %c0_51] : memref<8x1xf32, #tpu.memory_space<vmem>>, vector<8x1xf32>
    %57 = vector.broadcast %56 : vector<8x1xf32> to vector<8x360xf32>
    %58 = arith.addf %55, %57 : vector<8x360xf32>
    %59 = vector.broadcast %0 : vector<1x360xf32> to vector<8x360xf32>
    %60 = arith.mulf %58, %59 : vector<8x360xf32>
    %cst_52 = arith.constant 0.000000e+00 : bf16
    %61 = vector.broadcast %cst_52 : bf16 to vector<8x512xbf16>
    %c0_53 = arith.constant 0 : index
    %c0_54 = arith.constant 0 : index
    %62 = vector.load %arg12[%c0_53, %c0_54] : memref<8x512xbf16, #tpu.memory_space<vmem>>, vector<8x512xbf16>
    tpu.vector_store %arg12[%c0_53, %c0_54], %61 {strides = array<i32>} : memref<8x512xbf16, #tpu.memory_space<vmem>>, vector<8x512xbf16>,
    %63 = arith.truncf %60 : vector<8x360xf32> to vector<8x360xbf16>
    %c0_55 = arith.constant 0 : index
    %c21_56 = arith.constant 21 : index
    %64 = vector.load %arg12[%c0_55, %c21_56] : memref<8x512xbf16, #tpu.memory_space<vmem>>, vector<8x360xbf16>
    tpu.vector_store %arg12[%c0_55, %c21_56], %63 {strides = array<i32>} : memref<8x512xbf16, #tpu.memory_space<vmem>>, vector<8x360xbf16>,
    %cst_57 = arith.constant 0.000000e+00 : f32
    %65 = vector.broadcast %cst_57 : f32 to vector<8x360xf32>
    %c0_58 = arith.constant 0 : index
    %c0_59 = arith.constant 0 : index
    %c0_60 = arith.constant 0 : index
    %66 = vector.load %arg5[%c0_58, %c0_59, %c0_60] : memref<9x8x8xbf16, #tpu.memory_space<vmem>>, vector<1x8x8xbf16>
    %67 = vector.shape_cast %66 : vector<1x8x8xbf16> to vector<8x8xbf16>
    %c0_61 = arith.constant 0 : index
    %c0_62 = arith.constant 0 : index
    %c0_63 = arith.constant 0 : index
    %68 = vector.load %arg2[%c0_61, %c0_62, %c0_63] : memref<1x8x512xbf16, #tpu.memory_space<vmem>>, vector<1x8x360xbf16>
    %69 = vector.shape_cast %68 : vector<1x8x360xbf16> to vector<8x360xbf16>
    %cst_64 = arith.constant dense<0.000000e+00> : vector<8x360xf32>
    %70 = tpu.matmul %67, %69, %cst_64 {dimension_numbers = #tpu.dot_dimension_numbers<[1], [0], [0], [1], [0, 0, 1, 1], [], []>} : vector<8x8xbf16>, vector<8x360xbf16>, vector<8x360xf32> -> vector<8x360xf32>
    %71 = arith.addf %65, %70 : vector<8x360xf32>
    %c1_65 = arith.constant 1 : index
    %c0_66 = arith.constant 0 : index
    %c0_67 = arith.constant 0 : index
    %72 = vector.load %arg5[%c1_65, %c0_66, %c0_67] : memref<9x8x8xbf16, #tpu.memory_space<vmem>>, vector<1x8x8xbf16>
    %73 = vector.shape_cast %72 : vector<1x8x8xbf16> to vector<8x8xbf16>
    %c0_68 = arith.constant 0 : index
    %c0_69 = arith.constant 0 : index
    %c1_70 = arith.constant 1 : index
    %74 = vector.load %arg2[%c0_68, %c0_69, %c1_70] : memref<1x8x512xbf16, #tpu.memory_space<vmem>>, vector<1x8x360xbf16>
    %75 = vector.shape_cast %74 : vector<1x8x360xbf16> to vector<8x360xbf16>
    %cst_71 = arith.constant dense<0.000000e+00> : vector<8x360xf32>
    %76 = tpu.matmul %73, %75, %cst_71 {dimension_numbers = #tpu.dot_dimension_numbers<[1], [0], [0], [1], [0, 0, 1, 1], [], []>} : vector<8x8xbf16>, vector<8x360xbf16>, vector<8x360xf32> -> vector<8x360xf32>
    %77 = arith.addf %71, %76 : vector<8x360xf32>
    %c2_72 = arith.constant 2 : index
    %c0_73 = arith.constant 0 : index
    %c0_74 = arith.constant 0 : index
    %78 = vector.load %arg5[%c2_72, %c0_73, %c0_74] : memref<9x8x8xbf16, #tpu.memory_space<vmem>>, vector<1x8x8xbf16>
    %79 = vector.shape_cast %78 : vector<1x8x8xbf16> to vector<8x8xbf16>
    %c0_75 = arith.constant 0 : index
    %c0_76 = arith.constant 0 : index
    %c2_77 = arith.constant 2 : index
    %80 = vector.load %arg2[%c0_75, %c0_76, %c2_77] : memref<1x8x512xbf16, #tpu.memory_space<vmem>>, vector<1x8x360xbf16>
    %81 = vector.shape_cast %80 : vector<1x8x360xbf16> to vector<8x360xbf16>
    %cst_78 = arith.constant dense<0.000000e+00> : vector<8x360xf32>
    %82 = tpu.matmul %79, %81, %cst_78 {dimension_numbers = #tpu.dot_dimension_numbers<[1], [0], [0], [1], [0, 0, 1, 1], [], []>} : vector<8x8xbf16>, vector<8x360xbf16>, vector<8x360xf32> -> vector<8x360xf32>
    %83 = arith.addf %77, %82 : vector<8x360xf32>
    %c3_79 = arith.constant 3 : index
    %c0_80 = arith.constant 0 : index
    %c0_81 = arith.constant 0 : index
    %84 = vector.load %arg5[%c3_79, %c0_80, %c0_81] : memref<9x8x8xbf16, #tpu.memory_space<vmem>>, vector<1x8x8xbf16>
    %85 = vector.shape_cast %84 : vector<1x8x8xbf16> to vector<8x8xbf16>
    %c0_82 = arith.constant 0 : index
    %c0_83 = arith.constant 0 : index
    %c20_84 = arith.constant 20 : index
    %86 = vector.load %arg2[%c0_82, %c0_83, %c20_84] : memref<1x8x512xbf16, #tpu.memory_space<vmem>>, vector<1x8x360xbf16>
    %87 = vector.shape_cast %86 : vector<1x8x360xbf16> to vector<8x360xbf16>
    %cst_85 = arith.constant dense<0.000000e+00> : vector<8x360xf32>
    %88 = tpu.matmul %85, %87, %cst_85 {dimension_numbers = #tpu.dot_dimension_numbers<[1], [0], [0], [1], [0, 0, 1, 1], [], []>} : vector<8x8xbf16>, vector<8x360xbf16>, vector<8x360xf32> -> vector<8x360xf32>
    %89 = arith.addf %83, %88 : vector<8x360xf32>
    %c4_86 = arith.constant 4 : index
    %c0_87 = arith.constant 0 : index
    %c0_88 = arith.constant 0 : index
    %90 = vector.load %arg5[%c4_86, %c0_87, %c0_88] : memref<9x8x8xbf16, #tpu.memory_space<vmem>>, vector<1x8x8xbf16>
    %91 = vector.shape_cast %90 : vector<1x8x8xbf16> to vector<8x8xbf16>
    %c0_89 = arith.constant 0 : index
    %c0_90 = arith.constant 0 : index
    %c21_91 = arith.constant 21 : index
    %92 = vector.load %arg2[%c0_89, %c0_90, %c21_91] : memref<1x8x512xbf16, #tpu.memory_space<vmem>>, vector<1x8x360xbf16>
    %93 = vector.shape_cast %92 : vector<1x8x360xbf16> to vector<8x360xbf16>
    %cst_92 = arith.constant dense<0.000000e+00> : vector<8x360xf32>
    %94 = tpu.matmul %91, %93, %cst_92 {dimension_numbers = #tpu.dot_dimension_numbers<[1], [0], [0], [1], [0, 0, 1, 1], [], []>} : vector<8x8xbf16>, vector<8x360xbf16>, vector<8x360xf32> -> vector<8x360xf32>
    %95 = arith.addf %89, %94 : vector<8x360xf32>
    %c5_93 = arith.constant 5 : index
    %c0_94 = arith.constant 0 : index
    %c0_95 = arith.constant 0 : index
    %96 = vector.load %arg5[%c5_93, %c0_94, %c0_95] : memref<9x8x8xbf16, #tpu.memory_space<vmem>>, vector<1x8x8xbf16>
    %97 = vector.shape_cast %96 : vector<1x8x8xbf16> to vector<8x8xbf16>
    %c0_96 = arith.constant 0 : index
    %c0_97 = arith.constant 0 : index
    %c22_98 = arith.constant 22 : index
    %98 = vector.load %arg2[%c0_96, %c0_97, %c22_98] : memref<1x8x512xbf16, #tpu.memory_space<vmem>>, vector<1x8x360xbf16>
    %99 = vector.shape_cast %98 : vector<1x8x360xbf16> to vector<8x360xbf16>
    %cst_99 = arith.constant dense<0.000000e+00> : vector<8x360xf32>
    %100 = tpu.matmul %97, %99, %cst_99 {dimension_numbers = #tpu.dot_dimension_numbers<[1], [0], [0], [1], [0, 0, 1, 1], [], []>} : vector<8x8xbf16>, vector<8x360xbf16>, vector<8x360xf32> -> vector<8x360xf32>
    %101 = arith.addf %95, %100 : vector<8x360xf32>
    %c6_100 = arith.constant 6 : index
    %c0_101 = arith.constant 0 : index
    %c0_102 = arith.constant 0 : index
    %102 = vector.load %arg5[%c6_100, %c0_101, %c0_102] : memref<9x8x8xbf16, #tpu.memory_space<vmem>>, vector<1x8x8xbf16>
    %103 = vector.shape_cast %102 : vector<1x8x8xbf16> to vector<8x8xbf16>
    %c0_103 = arith.constant 0 : index
    %c0_104 = arith.constant 0 : index
    %c40_105 = arith.constant 40 : index
    %104 = vector.load %arg2[%c0_103, %c0_104, %c40_105] : memref<1x8x512xbf16, #tpu.memory_space<vmem>>, vector<1x8x360xbf16>
    %105 = vector.shape_cast %104 : vector<1x8x360xbf16> to vector<8x360xbf16>
    %cst_106 = arith.constant dense<0.000000e+00> : vector<8x360xf32>
    %106 = tpu.matmul %103, %105, %cst_106 {dimension_numbers = #tpu.dot_dimension_numbers<[1], [0], [0], [1], [0, 0, 1, 1], [], []>} : vector<8x8xbf16>, vector<8x360xbf16>, vector<8x360xf32> -> vector<8x360xf32>
    %107 = arith.addf %101, %106 : vector<8x360xf32>
    %c7_107 = arith.constant 7 : index
    %c0_108 = arith.constant 0 : index
    %c0_109 = arith.constant 0 : index
    %108 = vector.load %arg5[%c7_107, %c0_108, %c0_109] : memref<9x8x8xbf16, #tpu.memory_space<vmem>>, vector<1x8x8xbf16>
    %109 = vector.shape_cast %108 : vector<1x8x8xbf16> to vector<8x8xbf16>
    %c0_110 = arith.constant 0 : index
    %c0_111 = arith.constant 0 : index
    %c41_112 = arith.constant 41 : index
    %110 = vector.load %arg2[%c0_110, %c0_111, %c41_112] : memref<1x8x512xbf16, #tpu.memory_space<vmem>>, vector<1x8x360xbf16>
    %111 = vector.shape_cast %110 : vector<1x8x360xbf16> to vector<8x360xbf16>
    %cst_113 = arith.constant dense<0.000000e+00> : vector<8x360xf32>
    %112 = tpu.matmul %109, %111, %cst_113 {dimension_numbers = #tpu.dot_dimension_numbers<[1], [0], [0], [1], [0, 0, 1, 1], [], []>} : vector<8x8xbf16>, vector<8x360xbf16>, vector<8x360xf32> -> vector<8x360xf32>
    %113 = arith.addf %107, %112 : vector<8x360xf32>
    %c8_114 = arith.constant 8 : index
    %c0_115 = arith.constant 0 : index
    %c0_116 = arith.constant 0 : index
    %114 = vector.load %arg5[%c8_114, %c0_115, %c0_116] : memref<9x8x8xbf16, #tpu.memory_space<vmem>>, vector<1x8x8xbf16>
    %115 = vector.shape_cast %114 : vector<1x8x8xbf16> to vector<8x8xbf16>
    %c0_117 = arith.constant 0 : index
    %c0_118 = arith.constant 0 : index
    %c42_119 = arith.constant 42 : index
    %116 = vector.load %arg2[%c0_117, %c0_118, %c42_119] : memref<1x8x512xbf16, #tpu.memory_space<vmem>>, vector<1x8x360xbf16>
    %117 = vector.shape_cast %116 : vector<1x8x360xbf16> to vector<8x360xbf16>
    %cst_120 = arith.constant dense<0.000000e+00> : vector<8x360xf32>
    %118 = tpu.matmul %115, %117, %cst_120 {dimension_numbers = #tpu.dot_dimension_numbers<[1], [0], [0], [1], [0, 0, 1, 1], [], []>} : vector<8x8xbf16>, vector<8x360xbf16>, vector<8x360xf32> -> vector<8x360xf32>
    %119 = arith.addf %113, %118 : vector<8x360xf32>
    %cst_121 = arith.constant 0.000000e+00 : f32
    %120 = vector.broadcast %cst_121 : f32 to vector<8x360xf32>
    %c0_122 = arith.constant 0 : index
    %c0_123 = arith.constant 0 : index
    %c0_124 = arith.constant 0 : index
    %121 = vector.load %arg6[%c0_122, %c0_123, %c0_124] : memref<9x8x8xbf16, #tpu.memory_space<vmem>>, vector<1x8x8xbf16>
    %122 = vector.shape_cast %121 : vector<1x8x8xbf16> to vector<8x8xbf16>
    %c0_125 = arith.constant 0 : index
    %c0_126 = arith.constant 0 : index
    %123 = vector.load %arg12[%c0_125, %c0_126] : memref<8x512xbf16, #tpu.memory_space<vmem>>, vector<8x360xbf16>
    %cst_127 = arith.constant dense<0.000000e+00> : vector<8x360xf32>
    %124 = tpu.matmul %122, %123, %cst_127 {dimension_numbers = #tpu.dot_dimension_numbers<[1], [0], [0], [1], [0, 0, 1, 1], [], []>} : vector<8x8xbf16>, vector<8x360xbf16>, vector<8x360xf32> -> vector<8x360xf32>
    %125 = arith.addf %120, %124 : vector<8x360xf32>
    %c1_128 = arith.constant 1 : index
    %c0_129 = arith.constant 0 : index
    %c0_130 = arith.constant 0 : index
    %126 = vector.load %arg6[%c1_128, %c0_129, %c0_130] : memref<9x8x8xbf16, #tpu.memory_space<vmem>>, vector<1x8x8xbf16>
    %127 = vector.shape_cast %126 : vector<1x8x8xbf16> to vector<8x8xbf16>
    %c0_131 = arith.constant 0 : index
    %c1_132 = arith.constant 1 : index
    %128 = vector.load %arg12[%c0_131, %c1_132] : memref<8x512xbf16, #tpu.memory_space<vmem>>, vector<8x360xbf16>
    %cst_133 = arith.constant dense<0.000000e+00> : vector<8x360xf32>
    %129 = tpu.matmul %127, %128, %cst_133 {dimension_numbers = #tpu.dot_dimension_numbers<[1], [0], [0], [1], [0, 0, 1, 1], [], []>} : vector<8x8xbf16>, vector<8x360xbf16>, vector<8x360xf32> -> vector<8x360xf32>
    %130 = arith.addf %125, %129 : vector<8x360xf32>
    %c2_134 = arith.constant 2 : index
    %c0_135 = arith.constant 0 : index
    %c0_136 = arith.constant 0 : index
    %131 = vector.load %arg6[%c2_134, %c0_135, %c0_136] : memref<9x8x8xbf16, #tpu.memory_space<vmem>>, vector<1x8x8xbf16>
    %132 = vector.shape_cast %131 : vector<1x8x8xbf16> to vector<8x8xbf16>
    %c0_137 = arith.constant 0 : index
    %c2_138 = arith.constant 2 : index
    %133 = vector.load %arg12[%c0_137, %c2_138] : memref<8x512xbf16, #tpu.memory_space<vmem>>, vector<8x360xbf16>
    %cst_139 = arith.constant dense<0.000000e+00> : vector<8x360xf32>
    %134 = tpu.matmul %132, %133, %cst_139 {dimension_numbers = #tpu.dot_dimension_numbers<[1], [0], [0], [1], [0, 0, 1, 1], [], []>} : vector<8x8xbf16>, vector<8x360xbf16>, vector<8x360xf32> -> vector<8x360xf32>
    %135 = arith.addf %130, %134 : vector<8x360xf32>
    %c3_140 = arith.constant 3 : index
    %c0_141 = arith.constant 0 : index
    %c0_142 = arith.constant 0 : index
    %136 = vector.load %arg6[%c3_140, %c0_141, %c0_142] : memref<9x8x8xbf16, #tpu.memory_space<vmem>>, vector<1x8x8xbf16>
    %137 = vector.shape_cast %136 : vector<1x8x8xbf16> to vector<8x8xbf16>
    %c0_143 = arith.constant 0 : index
    %c20_144 = arith.constant 20 : index
    %138 = vector.load %arg12[%c0_143, %c20_144] : memref<8x512xbf16, #tpu.memory_space<vmem>>, vector<8x360xbf16>
    %cst_145 = arith.constant dense<0.000000e+00> : vector<8x360xf32>
    %139 = tpu.matmul %137, %138, %cst_145 {dimension_numbers = #tpu.dot_dimension_numbers<[1], [0], [0], [1], [0, 0, 1, 1], [], []>} : vector<8x8xbf16>, vector<8x360xbf16>, vector<8x360xf32> -> vector<8x360xf32>
    %140 = arith.addf %135, %139 : vector<8x360xf32>
    %c4_146 = arith.constant 4 : index
    %c0_147 = arith.constant 0 : index
    %c0_148 = arith.constant 0 : index
    %141 = vector.load %arg6[%c4_146, %c0_147, %c0_148] : memref<9x8x8xbf16, #tpu.memory_space<vmem>>, vector<1x8x8xbf16>
    %142 = vector.shape_cast %141 : vector<1x8x8xbf16> to vector<8x8xbf16>
    %c0_149 = arith.constant 0 : index
    %c21_150 = arith.constant 21 : index
    %143 = vector.load %arg12[%c0_149, %c21_150] : memref<8x512xbf16, #tpu.memory_space<vmem>>, vector<8x360xbf16>
    %cst_151 = arith.constant dense<0.000000e+00> : vector<8x360xf32>
    %144 = tpu.matmul %142, %143, %cst_151 {dimension_numbers = #tpu.dot_dimension_numbers<[1], [0], [0], [1], [0, 0, 1, 1], [], []>} : vector<8x8xbf16>, vector<8x360xbf16>, vector<8x360xf32> -> vector<8x360xf32>
    %145 = arith.addf %140, %144 : vector<8x360xf32>
    %c5_152 = arith.constant 5 : index
    %c0_153 = arith.constant 0 : index
    %c0_154 = arith.constant 0 : index
    %146 = vector.load %arg6[%c5_152, %c0_153, %c0_154] : memref<9x8x8xbf16, #tpu.memory_space<vmem>>, vector<1x8x8xbf16>
    %147 = vector.shape_cast %146 : vector<1x8x8xbf16> to vector<8x8xbf16>
    %c0_155 = arith.constant 0 : index
    %c22_156 = arith.constant 22 : index
    %148 = vector.load %arg12[%c0_155, %c22_156] : memref<8x512xbf16, #tpu.memory_space<vmem>>, vector<8x360xbf16>
    %cst_157 = arith.constant dense<0.000000e+00> : vector<8x360xf32>
    %149 = tpu.matmul %147, %148, %cst_157 {dimension_numbers = #tpu.dot_dimension_numbers<[1], [0], [0], [1], [0, 0, 1, 1], [], []>} : vector<8x8xbf16>, vector<8x360xbf16>, vector<8x360xf32> -> vector<8x360xf32>
    %150 = arith.addf %145, %149 : vector<8x360xf32>
    %c6_158 = arith.constant 6 : index
    %c0_159 = arith.constant 0 : index
    %c0_160 = arith.constant 0 : index
    %151 = vector.load %arg6[%c6_158, %c0_159, %c0_160] : memref<9x8x8xbf16, #tpu.memory_space<vmem>>, vector<1x8x8xbf16>
    %152 = vector.shape_cast %151 : vector<1x8x8xbf16> to vector<8x8xbf16>
    %c0_161 = arith.constant 0 : index
    %c40_162 = arith.constant 40 : index
    %153 = vector.load %arg12[%c0_161, %c40_162] : memref<8x512xbf16, #tpu.memory_space<vmem>>, vector<8x360xbf16>
    %cst_163 = arith.constant dense<0.000000e+00> : vector<8x360xf32>
    %154 = tpu.matmul %152, %153, %cst_163 {dimension_numbers = #tpu.dot_dimension_numbers<[1], [0], [0], [1], [0, 0, 1, 1], [], []>} : vector<8x8xbf16>, vector<8x360xbf16>, vector<8x360xf32> -> vector<8x360xf32>
    %155 = arith.addf %150, %154 : vector<8x360xf32>
    %c7_164 = arith.constant 7 : index
    %c0_165 = arith.constant 0 : index
    %c0_166 = arith.constant 0 : index
    %156 = vector.load %arg6[%c7_164, %c0_165, %c0_166] : memref<9x8x8xbf16, #tpu.memory_space<vmem>>, vector<1x8x8xbf16>
    %157 = vector.shape_cast %156 : vector<1x8x8xbf16> to vector<8x8xbf16>
    %c0_167 = arith.constant 0 : index
    %c41_168 = arith.constant 41 : index
    %158 = vector.load %arg12[%c0_167, %c41_168] : memref<8x512xbf16, #tpu.memory_space<vmem>>, vector<8x360xbf16>
    %cst_169 = arith.constant dense<0.000000e+00> : vector<8x360xf32>
    %159 = tpu.matmul %157, %158, %cst_169 {dimension_numbers = #tpu.dot_dimension_numbers<[1], [0], [0], [1], [0, 0, 1, 1], [], []>} : vector<8x8xbf16>, vector<8x360xbf16>, vector<8x360xf32> -> vector<8x360xf32>
    %160 = arith.addf %155, %159 : vector<8x360xf32>
    %c8_170 = arith.constant 8 : index
    %c0_171 = arith.constant 0 : index
    %c0_172 = arith.constant 0 : index
    %161 = vector.load %arg6[%c8_170, %c0_171, %c0_172] : memref<9x8x8xbf16, #tpu.memory_space<vmem>>, vector<1x8x8xbf16>
    %162 = vector.shape_cast %161 : vector<1x8x8xbf16> to vector<8x8xbf16>
    %c0_173 = arith.constant 0 : index
    %c42_174 = arith.constant 42 : index
    %163 = vector.load %arg12[%c0_173, %c42_174] : memref<8x512xbf16, #tpu.memory_space<vmem>>, vector<8x360xbf16>
    %cst_175 = arith.constant dense<0.000000e+00> : vector<8x360xf32>
    %164 = tpu.matmul %162, %163, %cst_175 {dimension_numbers = #tpu.dot_dimension_numbers<[1], [0], [0], [1], [0, 0, 1, 1], [], []>} : vector<8x8xbf16>, vector<8x360xbf16>, vector<8x360xf32> -> vector<8x360xf32>
    %165 = arith.addf %160, %164 : vector<8x360xf32>
    %166 = arith.addf %119, %165 : vector<8x360xf32>
    %c0_176 = arith.constant 0 : index
    %c0_177 = arith.constant 0 : index
    %167 = vector.load %arg7[%c0_176, %c0_177] : memref<8x1xf32, #tpu.memory_space<vmem>>, vector<8x1xf32>
    %168 = vector.broadcast %167 : vector<8x1xf32> to vector<8x360xf32>
    %169 = arith.addf %166, %168 : vector<8x360xf32>
    %cst_178 = arith.constant 0.000000e+00 : f32
    %170 = vector.broadcast %cst_178 : f32 to vector<8x360xf32>
    %171 = arith.maximumf %169, %170 : vector<8x360xf32>
    %172 = vector.broadcast %0 : vector<1x360xf32> to vector<8x360xf32>
    %173 = arith.mulf %171, %172 : vector<8x360xf32>
    %cst_179 = arith.constant 0.000000e+00 : bf16
    %174 = vector.broadcast %cst_179 : bf16 to vector<8x512xbf16>
    %c0_180 = arith.constant 0 : index
    %c0_181 = arith.constant 0 : index
    %175 = vector.load %arg13[%c0_180, %c0_181] : memref<8x512xbf16, #tpu.memory_space<vmem>>, vector<8x512xbf16>
    tpu.vector_store %arg13[%c0_180, %c0_181], %174 {strides = array<i32>} : memref<8x512xbf16, #tpu.memory_space<vmem>>, vector<8x512xbf16>,
    %176 = arith.truncf %173 : vector<8x360xf32> to vector<8x360xbf16>
    %c0_182 = arith.constant 0 : index
    %c21_183 = arith.constant 21 : index
    %177 = vector.load %arg13[%c0_182, %c21_183] : memref<8x512xbf16, #tpu.memory_space<vmem>>, vector<8x360xbf16>
    tpu.vector_store %arg13[%c0_182, %c21_183], %176 {strides = array<i32>} : memref<8x512xbf16, #tpu.memory_space<vmem>>, vector<8x360xbf16>,
    %cst_184 = arith.constant 0.000000e+00 : f32
    %178 = vector.broadcast %cst_184 : f32 to vector<8x360xf32>
    %c0_185 = arith.constant 0 : index
    %c0_186 = arith.constant 0 : index
    %c0_187 = arith.constant 0 : index
    %179 = vector.load %arg8[%c0_185, %c0_186, %c0_187] : memref<9x8x8xbf16, #tpu.memory_space<vmem>>, vector<1x8x8xbf16>
    %180 = vector.shape_cast %179 : vector<1x8x8xbf16> to vector<8x8xbf16>
    %c0_188 = arith.constant 0 : index
    %c0_189 = arith.constant 0 : index
    %181 = vector.load %arg13[%c0_188, %c0_189] : memref<8x512xbf16, #tpu.memory_space<vmem>>, vector<8x360xbf16>
    %cst_190 = arith.constant dense<0.000000e+00> : vector<8x360xf32>
    %182 = tpu.matmul %180, %181, %cst_190 {dimension_numbers = #tpu.dot_dimension_numbers<[1], [0], [0], [1], [0, 0, 1, 1], [], []>} : vector<8x8xbf16>, vector<8x360xbf16>, vector<8x360xf32> -> vector<8x360xf32>
    %183 = arith.addf %178, %182 : vector<8x360xf32>
    %c1_191 = arith.constant 1 : index
    %c0_192 = arith.constant 0 : index
    %c0_193 = arith.constant 0 : index
    %184 = vector.load %arg8[%c1_191, %c0_192, %c0_193] : memref<9x8x8xbf16, #tpu.memory_space<vmem>>, vector<1x8x8xbf16>
    %185 = vector.shape_cast %184 : vector<1x8x8xbf16> to vector<8x8xbf16>
    %c0_194 = arith.constant 0 : index
    %c1_195 = arith.constant 1 : index
    %186 = vector.load %arg13[%c0_194, %c1_195] : memref<8x512xbf16, #tpu.memory_space<vmem>>, vector<8x360xbf16>
    %cst_196 = arith.constant dense<0.000000e+00> : vector<8x360xf32>
    %187 = tpu.matmul %185, %186, %cst_196 {dimension_numbers = #tpu.dot_dimension_numbers<[1], [0], [0], [1], [0, 0, 1, 1], [], []>} : vector<8x8xbf16>, vector<8x360xbf16>, vector<8x360xf32> -> vector<8x360xf32>
    %188 = arith.addf %183, %187 : vector<8x360xf32>
    %c2_197 = arith.constant 2 : index
    %c0_198 = arith.constant 0 : index
    %c0_199 = arith.constant 0 : index
    %189 = vector.load %arg8[%c2_197, %c0_198, %c0_199] : memref<9x8x8xbf16, #tpu.memory_space<vmem>>, vector<1x8x8xbf16>
    %190 = vector.shape_cast %189 : vector<1x8x8xbf16> to vector<8x8xbf16>
    %c0_200 = arith.constant 0 : index
    %c2_201 = arith.constant 2 : index
    %191 = vector.load %arg13[%c0_200, %c2_201] : memref<8x512xbf16, #tpu.memory_space<vmem>>, vector<8x360xbf16>
    %cst_202 = arith.constant dense<0.000000e+00> : vector<8x360xf32>
    %192 = tpu.matmul %190, %191, %cst_202 {dimension_numbers = #tpu.dot_dimension_numbers<[1], [0], [0], [1], [0, 0, 1, 1], [], []>} : vector<8x8xbf16>, vector<8x360xbf16>, vector<8x360xf32> -> vector<8x360xf32>
    %193 = arith.addf %188, %192 : vector<8x360xf32>
    %c3_203 = arith.constant 3 : index
    %c0_204 = arith.constant 0 : index
    %c0_205 = arith.constant 0 : index
    %194 = vector.load %arg8[%c3_203, %c0_204, %c0_205] : memref<9x8x8xbf16, #tpu.memory_space<vmem>>, vector<1x8x8xbf16>
    %195 = vector.shape_cast %194 : vector<1x8x8xbf16> to vector<8x8xbf16>
    %c0_206 = arith.constant 0 : index
    %c20_207 = arith.constant 20 : index
    %196 = vector.load %arg13[%c0_206, %c20_207] : memref<8x512xbf16, #tpu.memory_space<vmem>>, vector<8x360xbf16>
    %cst_208 = arith.constant dense<0.000000e+00> : vector<8x360xf32>
    %197 = tpu.matmul %195, %196, %cst_208 {dimension_numbers = #tpu.dot_dimension_numbers<[1], [0], [0], [1], [0, 0, 1, 1], [], []>} : vector<8x8xbf16>, vector<8x360xbf16>, vector<8x360xf32> -> vector<8x360xf32>
    %198 = arith.addf %193, %197 : vector<8x360xf32>
    %c4_209 = arith.constant 4 : index
    %c0_210 = arith.constant 0 : index
    %c0_211 = arith.constant 0 : index
    %199 = vector.load %arg8[%c4_209, %c0_210, %c0_211] : memref<9x8x8xbf16, #tpu.memory_space<vmem>>, vector<1x8x8xbf16>
    %200 = vector.shape_cast %199 : vector<1x8x8xbf16> to vector<8x8xbf16>
    %c0_212 = arith.constant 0 : index
    %c21_213 = arith.constant 21 : index
    %201 = vector.load %arg13[%c0_212, %c21_213] : memref<8x512xbf16, #tpu.memory_space<vmem>>, vector<8x360xbf16>
    %cst_214 = arith.constant dense<0.000000e+00> : vector<8x360xf32>
    %202 = tpu.matmul %200, %201, %cst_214 {dimension_numbers = #tpu.dot_dimension_numbers<[1], [0], [0], [1], [0, 0, 1, 1], [], []>} : vector<8x8xbf16>, vector<8x360xbf16>, vector<8x360xf32> -> vector<8x360xf32>
    %203 = arith.addf %198, %202 : vector<8x360xf32>
    %c5_215 = arith.constant 5 : index
    %c0_216 = arith.constant 0 : index
    %c0_217 = arith.constant 0 : index
    %204 = vector.load %arg8[%c5_215, %c0_216, %c0_217] : memref<9x8x8xbf16, #tpu.memory_space<vmem>>, vector<1x8x8xbf16>
    %205 = vector.shape_cast %204 : vector<1x8x8xbf16> to vector<8x8xbf16>
    %c0_218 = arith.constant 0 : index
    %c22_219 = arith.constant 22 : index
    %206 = vector.load %arg13[%c0_218, %c22_219] : memref<8x512xbf16, #tpu.memory_space<vmem>>, vector<8x360xbf16>
    %cst_220 = arith.constant dense<0.000000e+00> : vector<8x360xf32>
    %207 = tpu.matmul %205, %206, %cst_220 {dimension_numbers = #tpu.dot_dimension_numbers<[1], [0], [0], [1], [0, 0, 1, 1], [], []>} : vector<8x8xbf16>, vector<8x360xbf16>, vector<8x360xf32> -> vector<8x360xf32>
    %208 = arith.addf %203, %207 : vector<8x360xf32>
    %c6_221 = arith.constant 6 : index
    %c0_222 = arith.constant 0 : index
    %c0_223 = arith.constant 0 : index
    %209 = vector.load %arg8[%c6_221, %c0_222, %c0_223] : memref<9x8x8xbf16, #tpu.memory_space<vmem>>, vector<1x8x8xbf16>
    %210 = vector.shape_cast %209 : vector<1x8x8xbf16> to vector<8x8xbf16>
    %c0_224 = arith.constant 0 : index
    %c40_225 = arith.constant 40 : index
    %211 = vector.load %arg13[%c0_224, %c40_225] : memref<8x512xbf16, #tpu.memory_space<vmem>>, vector<8x360xbf16>
    %cst_226 = arith.constant dense<0.000000e+00> : vector<8x360xf32>
    %212 = tpu.matmul %210, %211, %cst_226 {dimension_numbers = #tpu.dot_dimension_numbers<[1], [0], [0], [1], [0, 0, 1, 1], [], []>} : vector<8x8xbf16>, vector<8x360xbf16>, vector<8x360xf32> -> vector<8x360xf32>
    %213 = arith.addf %208, %212 : vector<8x360xf32>
    %c7_227 = arith.constant 7 : index
    %c0_228 = arith.constant 0 : index
    %c0_229 = arith.constant 0 : index
    %214 = vector.load %arg8[%c7_227, %c0_228, %c0_229] : memref<9x8x8xbf16, #tpu.memory_space<vmem>>, vector<1x8x8xbf16>
    %215 = vector.shape_cast %214 : vector<1x8x8xbf16> to vector<8x8xbf16>
    %c0_230 = arith.constant 0 : index
    %c41_231 = arith.constant 41 : index
    %216 = vector.load %arg13[%c0_230, %c41_231] : memref<8x512xbf16, #tpu.memory_space<vmem>>, vector<8x360xbf16>
    %cst_232 = arith.constant dense<0.000000e+00> : vector<8x360xf32>
    %217 = tpu.matmul %215, %216, %cst_232 {dimension_numbers = #tpu.dot_dimension_numbers<[1], [0], [0], [1], [0, 0, 1, 1], [], []>} : vector<8x8xbf16>, vector<8x360xbf16>, vector<8x360xf32> -> vector<8x360xf32>
    %218 = arith.addf %213, %217 : vector<8x360xf32>
    %c8_233 = arith.constant 8 : index
    %c0_234 = arith.constant 0 : index
    %c0_235 = arith.constant 0 : index
    %219 = vector.load %arg8[%c8_233, %c0_234, %c0_235] : memref<9x8x8xbf16, #tpu.memory_space<vmem>>, vector<1x8x8xbf16>
    %220 = vector.shape_cast %219 : vector<1x8x8xbf16> to vector<8x8xbf16>
    %c0_236 = arith.constant 0 : index
    %c42_237 = arith.constant 42 : index
    %221 = vector.load %arg13[%c0_236, %c42_237] : memref<8x512xbf16, #tpu.memory_space<vmem>>, vector<8x360xbf16>
    %cst_238 = arith.constant dense<0.000000e+00> : vector<8x360xf32>
    %222 = tpu.matmul %220, %221, %cst_238 {dimension_numbers = #tpu.dot_dimension_numbers<[1], [0], [0], [1], [0, 0, 1, 1], [], []>} : vector<8x8xbf16>, vector<8x360xbf16>, vector<8x360xf32> -> vector<8x360xf32>
    %223 = arith.addf %218, %222 : vector<8x360xf32>
    %c0_239 = arith.constant 0 : index
    %c0_240 = arith.constant 0 : index
    %224 = vector.load %arg9[%c0_239, %c0_240] : memref<8x1xf32, #tpu.memory_space<vmem>>, vector<8x1xf32>
    %225 = vector.broadcast %224 : vector<8x1xf32> to vector<8x360xf32>
    %226 = arith.addf %223, %225 : vector<8x360xf32>
    %cst_241 = arith.constant 0.000000e+00 : f32
    %227 = vector.broadcast %cst_241 : f32 to vector<8x360xf32>
    %228 = arith.maximumf %226, %227 : vector<8x360xf32>
    %c0_242 = arith.constant 0 : index
    %c0_243 = arith.constant 0 : index
    %c0_244 = arith.constant 0 : index
    %229 = vector.load %arg11[%c0_242, %c0_243, %c0_244] : memref<1x8x360xf32, #tpu.memory_space<vmem>>, vector<1x8x360xf32>
    %230 = vector.shape_cast %229 : vector<1x8x360xf32> to vector<8x360xf32>
    %231 = vector.shape_cast %228 : vector<8x360xf32> to vector<1x8x360xf32>
    tpu.vector_store %arg11[%c0_242, %c0_243, %c0_244], %231 {strides = array<i32>} : memref<1x8x360xf32, #tpu.memory_space<vmem>>, vector<1x8x360xf32>,
    return
  }
  func.func @transform_0(%arg0: i32) -> (i32, i32, i32) {
    %c0_i32 = arith.constant 0 : i32
    %c0_i32_0 = arith.constant 0 : i32
    %c0_i32_1 = arith.constant 0 : i32
    return %arg0, %c0_i32, %c0_i32_0 : i32, i32, i32
  }
  func.func @transform_1(%arg0: i32) -> (i32, i32, i32) {
    %c0_i32 = arith.constant 0 : i32
    %c0_i32_0 = arith.constant 0 : i32
    %c0_i32_1 = arith.constant 0 : i32
    return %arg0, %c0_i32, %c0_i32_0 : i32, i32, i32
  }
  func.func @transform_2(%arg0: i32) -> (i32, i32, i32) {
    %c0_i32 = arith.constant 0 : i32
    %c0_i32_0 = arith.constant 0 : i32
    %c0_i32_1 = arith.constant 0 : i32
    %c0_i32_2 = arith.constant 0 : i32
    return %c0_i32, %c0_i32_0, %c0_i32_1 : i32, i32, i32
  }
  func.func @transform_3(%arg0: i32) -> (i32, i32) {
    %c0_i32 = arith.constant 0 : i32
    %c0_i32_0 = arith.constant 0 : i32
    %c0_i32_1 = arith.constant 0 : i32
    return %c0_i32, %c0_i32_0 : i32, i32
  }
  func.func @transform_4(%arg0: i32) -> (i32, i32, i32) {
    %c0_i32 = arith.constant 0 : i32
    %c0_i32_0 = arith.constant 0 : i32
    %c0_i32_1 = arith.constant 0 : i32
    %c0_i32_2 = arith.constant 0 : i32
    return %c0_i32, %c0_i32_0, %c0_i32_1 : i32, i32, i32
  }
  func.func @transform_5(%arg0: i32) -> (i32, i32, i32) {
    %c0_i32 = arith.constant 0 : i32
    %c0_i32_0 = arith.constant 0 : i32
    %c0_i32_1 = arith.constant 0 : i32
    %c0_i32_2 = arith.constant 0 : i32
    return %c0_i32, %c0_i32_0, %c0_i32_1 : i32, i32, i32
  }
  func.func @transform_6(%arg0: i32) -> (i32, i32) {
    %c0_i32 = arith.constant 0 : i32
    %c0_i32_0 = arith.constant 0 : i32
    %c0_i32_1 = arith.constant 0 : i32
    return %c0_i32, %c0_i32_0 : i32, i32
  }
  func.func @transform_7(%arg0: i32) -> (i32, i32, i32) {
    %c0_i32 = arith.constant 0 : i32
    %c0_i32_0 = arith.constant 0 : i32
    %c0_i32_1 = arith.constant 0 : i32
    %c0_i32_2 = arith.constant 0 : i32
    return %c0_i32, %c0_i32_0, %c0_i32_1 : i32, i32, i32
  }
  func.func @transform_8(%arg0: i32) -> (i32, i32) {
    %c0_i32 = arith.constant 0 : i32
    %c0_i32_0 = arith.constant 0 : i32
    %c0_i32_1 = arith.constant 0 : i32
    return %c0_i32, %c0_i32_0 : i32, i32
  }
  func.func @transform_9(%arg0: i32) -> (i32, i32) {
    %c0_i32 = arith.constant 0 : i32
    %c0_i32_0 = arith.constant 0 : i32
    %c0_i32_1 = arith.constant 0 : i32
    return %c0_i32, %c0_i32_0 : i32, i32
  }
  func.func @transform_10(%arg0: i32) -> (i32, i32, i32) {
    %c0_i32 = arith.constant 0 : i32
    %c0_i32_0 = arith.constant 0 : i32
    %c0_i32_1 = arith.constant 0 : i32
    return %arg0, %c0_i32, %c0_i32_0 : i32, i32, i32
  }
}

</mosaic_0001>

<bundles_post_ra>
// kernel: up_conv_block_forward.1
= control target key start
LH: loop header
LB: loop body
LE: loop exit
PB: predicated region body
PF: predicated region fallthrough
CT: control target
= control target key end

     0   :  { %s5006_s13 = smov 0   ;;  %s5764_s0 = inlined_call_operand.vmem [shape: bf16[2,16,512], index: 0, kind: input, shape index: {}]   ;;  %s5765_s1 = inlined_call_operand.vmem [shape: bf16[2,8,512], index: 1, kind: input, shape index: {}]   ;;  %s5766_s2 = inlined_call_operand.vmem [shape: bf16[9,8,16], index: 2, kind: input, shape index: {}]   ;;  %s5767_s3 = inlined_call_operand.vmem [shape: f32[8,1], index: 3, kind: input, shape index: {}]   ;;  %s5768_s4 = inlined_call_operand.vmem [shape: bf16[9,8,8], index: 4, kind: input, shape index: {}]   ;;  %s5769_s5 = inlined_call_operand.vmem [shape: bf16[9,8,8], index: 5, kind: input, shape index: {}]   ;;  %s5770_s6 = inlined_call_operand.vmem [shape: f32[8,1], index: 6, kind: input, shape index: {}]   ;;  %s5771_s7 = inlined_call_operand.vmem [shape: bf16[9,8,8], index: 7, kind: input, shape index: {}]   ;;  %s5772_s8 = inlined_call_operand.vmem [shape: f32[8,1], index: 8, kind: input, shape index: {}]   ;;  %s5773_s9 = inlined_call_operand.vmem [shape: f32[1,360], index: 9, kind: input, shape index: {}]   ;;  %s5774_s10 = inlined_call_operand.vmem [shape: f32[2,8,360], index: 10, kind: output, shape index: {}]  }
   0x1 LB: > { %s4416_s14 = sadd.s32 4294967295, %s4937_s13   ;;  %p4420_p0 = scmp.ge.s32.totalorder %s4937_s13, 1  ;;  %s4937_s13 = sphi %s5006_s13, %s20_s13  }
   0x2   : > { %p322_p1 = scmp.lt.s32.totalorder %s4937_s13, 3 }
   0x4   : > { %p323_p2 = pnand %p4420_p0, %p322_p1 }
   0x5   : > { %p365_p3 = scmp.lt.s32.totalorder (!%p323_p2), %s4416_s14, 1  ;;  %v4939_v0 = vmov (!%p323_p2), 0.0   ;;  %vm4940_vm0 = vmmov (!%p323_p2), 0   ;;  %v4941_v1 = vmov (!%p323_p2), 0   ;;  %s4942_s19 = smov (!%p323_p2), 127   ;;  %v1322_v7 = vld [vmem:[%s5767_s3] sm:$0xff] (!%p323_p2) }
   0x6   : > { %326 = sbr.rel (%p323_p2) target bundleno = 1503 (0x5df), region = 60  ;;  %4669 = vmatprep.subr.bf16.mxu1 (!%p323_p2), %v4939_v0  ;;  %4671 = vmatprep.mubr.msk.bf16.mxu1 (!%p323_p2), %vm4940_vm0, %v4939_v0  ;;  %1350 = vst [vmem:[#allocation2] sm:$0xff] (!%p323_p2), %v4941_v1  ;;  %1351 = vst [vmem:[#allocation2 + $0x8] sm:$0xff] (!%p323_p2), %v4941_v1  ;;  %s4943_s20 = smov (!%p323_p2), 126   ;;  %vm408_vm1 = vcmask (!%p323_p2), 1039360   ;;  %vm414_vm2 = vcmask (!%p323_p2), 130048  }
   0x7   : > { %450 = vmatprep.mubr.bf16.mxu0 (!%p323_p2), %v4941_v1  ;;  %3339 = vst [vmem:[#allocation3] sm:$0xff] (!%p323_p2), %v4941_v1  ;;  %3340 = vst [vmem:[#allocation3 + $0x8] sm:$0xff] (!%p323_p2), %v4941_v1  ;;  %4906 = vset.pattern.permute.xlu1 (!%p323_p2), %v4941_v1  ;;  %s4944_s21 = smov (!%p323_p2), 108   ;;  %s4945_s22 = smov (!%p323_p2), 107   ;;  %v4426_v12 = vld [vmem:[%s5766_s2 + $0x4] sm:$0xf] (!%p323_p2) }
   0x8   : > { %4907 = vset.pattern.permute.xlu0 (!%p323_p2), %v4941_v1  ;;  %s4946_s23 = smov (!%p323_p2), 106   ;;  %s4947_s24 = smov (!%p323_p2), 88   ;;  %vm594_vm3 = vcmask (!%p323_p2), 1031168   ;;  %v382_v19 = vld [vmem:[%s5766_s2] sm:$0xf] (!%p323_p2)  ;;  %vm695_vm4 = vcmask (!%p323_p2), 883712  }
   0x9   : > { %s4948_s25 = smov (!%p323_p2), 87   ;;  %s4949_s26 = smov (!%p323_p2), 86   ;;  %v4434_v26 = vld [vmem:[%s5766_s2 + $0x8] sm:$0xf] (!%p323_p2)  ;;  %vm796_vm5 = vcmask (!%p323_p2), 875520   ;;  %vm897_vm6 = vcmask (!%p323_p2), 867328  }
   0xa   : > { %v4437_v33 = vld [vmem:[%s5766_s2 + $0xc] sm:$0xf] (!%p323_p2)  ;;  %v4440_v39 = vld [vmem:[%s5766_s2 + $0x10] sm:$0xf] (!%p323_p2)  ;;  %vm1020_vm7 = vcmask (!%p323_p2), 719872   ;;  %vm1124_vm8 = vcmask (!%p323_p2), 711680  }
   0xb   : > { %v4443_v45 = vld [vmem:[%s5766_s2 + $0x14] sm:$0xf] (!%p323_p2)  ;;  %v4446_v51 = vld [vmem:[%s5766_s2 + $0x18] sm:$0xf] (!%p323_p2)  ;;  %vm1228_vm9 = vcmask (!%p323_p2), 703488   ;;  %vm1404_vm10 = vcmask (!%p323_p2), 1043456  }
   0xc   : > { %v4453_v58 = vld [vmem:[%s5766_s2 + $0x1c] sm:$0xf] (!%p323_p2)  ;;  %v4456_v62 = vld [vmem:[%s5766_s2 + $0x20] sm:$0xf] (!%p323_p2)  ;;  %vm1400_vm11 = vcmask (!%p323_p2), 64512   ;;  %vm1373_vm12 = vcmask (!%p323_p2), 1043624  }
   0xd   : > { %s5778_s14 = smov (!%p365_p3, %s4416_s14), 1  ;;  %vm1374_vm13 = vcmask 1047556   ;;  %vm1368_vm14 = vcmask 171008  }
   0xe   : > { %s4591_s15 = sshll.u32 %s5778_s14, 5  ;;  %s4592_s27 = sshll.u32 %s5778_s14, 4  ;;  %vm5277_vm15 = vmor %vm1374_vm13, %vm1373_vm12 }
   0xf   : > { %s369_s18 = scalar_lea.vmem %s5764_s0, %s4591_s15  ;;  %s5175_s30 = scalar_lea.vmem %s5765_s1, %s4592_s27 }
  0x10   : > { %v4908_v2 = vld [vmem:[%s369_s18 + $0x4] ss:$16 sps:$4 sm:$0xff]   ;;  %v5030_v3 = vld [vmem:[%s369_s18] ss:$16 sps:$4 sm:$0xff]   ;;  %v4911_v4 = vld [vmem:[%s369_s18 + $0x8] ss:$16 sps:$4 sm:$0xff]  }
  0x11   : > { %404 = vrot.lane.b32.xlu0 %v4908_v2, %s4942_s19  ;;  %402 = vrot.lane.b32.xlu1 %v5030_v3, %s4942_s19  ;;  %v4912_v5 = vld [vmem:[%s369_s18 + $0x8] ss:$16 sps:$4 sm:$0xff]   ;;  %v4914_v6 = vld [vmem:[%s369_s18 + $0xc] ss:$16 sps:$4 sm:$0xff]   ;;  %s4950_s15 = smov 21  }
  0x12   : > { %v1380_v63 = vld [vmem:[%s5175_s30] sm:$0xff] }
  0x15   : > { %406 = vrot.lane.b32.xlu0 %v4911_v4, %s4942_s19  ;;  %590 = vrot.lane.b32.xlu1 %v4908_v2, %s4943_s20 }
  0x19   : > { %592 = vrot.lane.b32.xlu0 %v4911_v4, %s4943_s20  ;;  %588 = vrot.lane.b32.xlu1 %v5030_v3, %s4943_s20 }
  0x1d   : > { %691 = vrot.lane.b32.xlu0 %v4908_v2, %s4944_s21  ;;  %693 = vrot.lane.b32.xlu1 %v4911_v4, %s4944_s21 }
  0x21   : > { %689 = vrot.lane.b32.xlu0 %v5030_v3, %s4944_s21  ;;  %792 = vrot.lane.b32.xlu1 %v4908_v2, %s4945_s22 }
  0x25   : > { %794 = vrot.lane.b32.xlu0 %v4911_v4, %s4945_s22  ;;  %790 = vrot.lane.b32.xlu1 %v5030_v3, %s4945_s22 }
  0x29   : > { %893 = vrot.lane.b32.xlu0 %v4908_v2, %s4946_s23  ;;  %895 = vrot.lane.b32.xlu1 %v4911_v4, %s4946_s23 }
  0x2d   : > { %891 = vrot.lane.b32.xlu0 %v5030_v3, %s4946_s23  ;;  %1014 = vrot.lane.b32.xlu1 %v4908_v2, %s4947_s24 }
  0x31   : > { %1016 = vrot.lane.b32.xlu0 %v4912_v5, %s4947_s24  ;;  %1012 = vrot.lane.b32.xlu1 %v5030_v3, %s4947_s24 }
  0x35   : > { %1018 = vrot.lane.b32.xlu0 %v4914_v6, %s4947_s24  ;;  %1118 = vrot.lane.b32.xlu1 %v4908_v2, %s4948_s25 }
  0x39   : > { %1120 = vrot.lane.b32.xlu0 %v4912_v5, %s4948_s25  ;;  %1116 = vrot.lane.b32.xlu1 %v5030_v3, %s4948_s25 }
  0x3d   : > { %1122 = vrot.lane.b32.xlu0 %v4914_v6, %s4948_s25  ;;  %1222 = vrot.lane.b32.xlu1 %v4908_v2, %s4949_s26 }
  0x41   : > { %1224 = vrot.lane.b32.xlu0 %v4912_v5, %s4949_s26  ;;  %1220 = vrot.lane.b32.xlu1 %v5030_v3, %s4949_s26 }
  0x45   : > { %1226 = vrot.lane.b32.xlu0 %v4914_v6, %s4949_s26  ;;  %1325 = vperm.xlu1 %4906, %v1322_v7  }
  0x83   : > { %v405_v8 = vpop.permute.xlu0 %404  ;;  %v403_v9 = vpop.permute.xlu1 %402 }
  0x84   : > { %v409_v14 = vsel %vm408_vm1, %v403_v9, %v405_v8 }
  0x87   : > { %v407_v10 = vpop.permute.xlu0 %406  ;;  %v591_v13 = vpop.permute.xlu1 %590 }
  0x88   : > { %4670 = vmatpush3.bf16.msra.mxu1 %v407_v10  ;;  %v410_v11 = vsel %vm408_vm1, %v405_v8, %v407_v10 }
  0x89   : > { %418 = vmatprep.subr.bf16.mxu0 %v410_v11  ;;  %4675 = vmatprep.subr.bf16.mxu1 %v4939_v0 }
  0x8a   : > { %419 = vmatpush1.bf16.msra.mxu0 %v409_v14 }
  0x8b   : > { %4672 = vmatmul.mubr.msk.bf16.vlgmr.msra.gmra.mrb[0].mxu1 %vm414_vm2, %v4426_v12  ;;  %505 = vmatprep.subr.bf16.mxu0 %v4908_v2  ;;  %v593_v15 = vpop.permute.xlu0 %592  ;;  %v589_v16 = vpop.permute.xlu1 %588  ;;  %v5178_v2 = vcombine.low %v1380_v63, %v1380_v63 }
  0x8c   : > { %4676 = vmatpush3.bf16.msra.mxu1 %v4911_v4  ;;  %4677 = vmatprep.mubr.msk.bf16.mxu1 %vm4940_vm0, %v4939_v0  ;;  %v596_v17 = vsel %vm594_vm3, %v591_v13, %v593_v15  ;;  %v595_v21 = vsel %vm594_vm3, %v589_v16, %v591_v13  ;;  %v5187_v4 = vcombine.high %v1380_v63, %v1380_v63 }
  0x8d   : > { %4430 = vmatmul.mubr.msk.bf16.vlgmr.msra.gmra.mrb[0].mxu0 %vm414_vm2, %v4426_v12  ;;  %4681 = vmatprep.subr.bf16.mxu1 %v4939_v0 }
  0x8e   : > { %506 = vmatpush1.bf16.msra.mxu0 %v5030_v3  ;;  %537 = vmatprep.mubr.bf16.mxu0 %v4941_v1  ;;  %v5183_v3 = vld [vmem:[%s5175_s30 + $0x8] ss:$0 sps:$4 sm:$0xff]  }
  0x8f   : > { %603 = vmatprep.subr.bf16.mxu0 %v596_v17  ;;  %v692_v18 = vpop.permute.xlu0 %691  ;;  %v694_v20 = vpop.permute.xlu1 %693  ;;  %1392 = vrot.lane.b32.xlu0 %v5178_v2, %s4942_s19 }
  0x90   : > { %v697_v23 = vsel %vm695_vm4, %v692_v18, %v694_v20  ;;  %1394 = vrot.lane.b32.xlu1 %v5187_v4, %s4942_s19 }
  0x93   : > { %4678 = vmatmul.mubr.msk.bf16.vlgmr.msra.gmra.mrb[4].mxu1 %vm414_vm2, %v382_v19  ;;  %v690_v22 = vpop.permute.xlu0 %689  ;;  %v793_v24 = vpop.permute.xlu1 %792  ;;  %1396 = vrot.lane.b32.xlu0 %v5183_v3, %s4942_s19 }
  0x94   : > { %4682 = vmatpush3.bf16.msra.mxu1 %v593_v15  ;;  %4683 = vmatprep.mubr.msk.bf16.mxu1 %vm4940_vm0, %v4939_v0  ;;  %v696_v28 = vsel %vm695_vm4, %v690_v22, %v692_v18 }
  0x95   : > { %4432 = vmatmul.mubr.msk.bf16.vlgmr.msra.gmra.mrb[4].mxu0 %vm414_vm2, %v382_v19  ;;  %4687 = vmatprep.subr.bf16.mxu1 %v4939_v0 }
  0x96   : > { %604 = vmatpush1.bf16.msra.mxu0 %v595_v21  ;;  %635 = vmatprep.mubr.bf16.mxu0 %v4941_v1 }
  0x97   : > { %704 = vmatprep.subr.bf16.mxu0 %v697_v23  ;;  %v795_v25 = vpop.permute.xlu0 %794  ;;  %v791_v27 = vpop.permute.xlu1 %790 }
  0x98   : > { %v798_v30 = vsel %vm796_vm5, %v793_v24, %v795_v25  ;;  %v797_v35 = vsel %vm796_vm5, %v791_v27, %v793_v24 }
  0x9b   : > { %4684 = vmatmul.mubr.msk.bf16.vlgmr.msra.gmra.mrb[8].mxu1 %vm414_vm2, %v4434_v26  ;;  %v894_v29 = vpop.permute.xlu0 %893  ;;  %v896_v31 = vpop.permute.xlu1 %895 }
  0x9c   : > { %4688 = vmatpush3.bf16.msra.mxu1 %v694_v20  ;;  %4689 = vmatprep.mubr.msk.bf16.mxu1 %vm4940_vm0, %v4939_v0  ;;  %v899_v37 = vsel %vm897_vm6, %v894_v29, %v896_v31 }
  0x9d   : > { %4435 = vmatmul.mubr.msk.bf16.vlgmr.msra.gmra.mrb[8].mxu0 %vm414_vm2, %v4434_v26  ;;  %4693 = vmatprep.subr.bf16.mxu1 %v4939_v0 }
  0x9e   : > { %705 = vmatpush1.bf16.msra.mxu0 %v696_v28  ;;  %736 = vmatprep.mubr.bf16.mxu0 %v4941_v1 }
  0x9f   : > { %805 = vmatprep.subr.bf16.mxu0 %v798_v30  ;;  %v892_v32 = vpop.permute.xlu0 %891  ;;  %v1015_v34 = vpop.permute.xlu1 %1014 }
  0xa0   : > { %v898_v41 = vsel %vm897_vm6, %v892_v32, %v894_v29 }
  0xa3   : > { %4690 = vmatmul.mubr.msk.bf16.vlgmr.msra.gmra.mrb[12].mxu1 %vm414_vm2, %v4437_v33  ;;  %v1017_v36 = vpop.permute.xlu0 %1016  ;;  %v1013_v40 = vpop.permute.xlu1 %1012 }
  0xa4   : > { %4694 = vmatpush3.bf16.msra.mxu1 %v795_v25  ;;  %4695 = vmatprep.mubr.msk.bf16.mxu1 %vm4940_vm0, %v4939_v0  ;;  %v1022_v42 = vsel %vm1020_vm7, %v1015_v34, %v1017_v36  ;;  %v1021_v48 = vsel %vm1020_vm7, %v1013_v40, %v1015_v34 }
  0xa5   : > { %4438 = vmatmul.mubr.msk.bf16.vlgmr.msra.gmra.mrb[12].mxu0 %vm414_vm2, %v4437_v33  ;;  %4699 = vmatprep.subr.bf16.mxu1 %v4939_v0 }
  0xa6   : > { %806 = vmatpush1.bf16.msra.mxu0 %v797_v35  ;;  %837 = vmatprep.mubr.bf16.mxu0 %v4941_v1 }
  0xa7   : > { %906 = vmatprep.subr.bf16.mxu0 %v899_v37  ;;  %v1019_v38 = vpop.permute.xlu0 %1018  ;;  %v1119_v44 = vpop.permute.xlu1 %1118 }
  0xa8   : > { %v1023_v46 = vsel %vm1020_vm7, %v1017_v36, %v1019_v38 }
  0xab   : > { %4696 = vmatmul.mubr.msk.bf16.vlgmr.msra.gmra.mrb[16].mxu1 %vm414_vm2, %v4440_v39  ;;  %v1121_v43 = vpop.permute.xlu0 %1120  ;;  %v1117_v49 = vpop.permute.xlu1 %1116 }
  0xac   : > { %4700 = vmatpush3.bf16.msra.mxu1 %v896_v31  ;;  %4701 = vmatprep.mubr.msk.bf16.mxu1 %vm4940_vm0, %v4939_v0  ;;  %v1126_v50 = vsel %vm1124_vm8, %v1119_v44, %v1121_v43  ;;  %v1125_v55 = vsel %vm1124_vm8, %v1117_v49, %v1119_v44 }
  0xad   : > { %4441 = vmatmul.mubr.msk.bf16.vlgmr.msra.gmra.mrb[16].mxu0 %vm414_vm2, %v4440_v39  ;;  %4705 = vmatprep.subr.bf16.mxu1 %v4939_v0 }
  0xae   : > { %907 = vmatpush1.bf16.msra.mxu0 %v898_v41  ;;  %938 = vmatprep.mubr.bf16.mxu0 %v4941_v1 }
  0xaf   : > { %1030 = vmatprep.subr.bf16.mxu0 %v1022_v42  ;;  %v1123_v47 = vpop.permute.xlu0 %1122  ;;  %v1223_v54 = vpop.permute.xlu1 %1222 }
  0xb0   : > { %v1127_v53 = vsel %vm1124_vm8, %v1121_v43, %v1123_v47 }
  0xb3   : > { %4702 = vmatmul.mubr.msk.bf16.vlgmr.msra.gmra.mrb[20].mxu1 %vm414_vm2, %v4443_v45  ;;  %v1225_v52 = vpop.permute.xlu0 %1224  ;;  %v1221_v59 = vpop.permute.xlu1 %1220 }
  0xb4   : > { %4706 = vmatpush3.bf16.msra.mxu1 %v1023_v46  ;;  %4707 = vmatprep.mubr.msk.bf16.mxu1 %vm4940_vm0, %v4939_v0  ;;  %v1230_v56 = vsel %vm1228_vm9, %v1223_v54, %v1225_v52  ;;  %v1229_v61 = vsel %vm1228_vm9, %v1221_v59, %v1223_v54 }
  0xb5   : > { %4444 = vmatmul.mubr.msk.bf16.vlgmr.msra.gmra.mrb[20].mxu0 %vm414_vm2, %v4443_v45  ;;  %4711 = vmatprep.subr.bf16.mxu1 %v4939_v0 }
  0xb6   : > { %1031 = vmatpush1.bf16.msra.mxu0 %v1021_v48  ;;  %1062 = vmatprep.mubr.bf16.mxu0 %v4941_v1 }
  0xb7   : > { %1134 = vmatprep.subr.bf16.mxu0 %v1126_v50  ;;  %v1227_v57 = vpop.permute.xlu0 %1226 }
  0xb8   : > { %v1231_v60 = vsel %vm1228_vm9, %v1225_v52, %v1227_v57 }
  0xbb   : > { %4708 = vmatmul.mubr.msk.bf16.vlgmr.msra.gmra.mrb[24].mxu1 %vm414_vm2, %v4446_v51 }
  0xbc   : > { %4712 = vmatpush3.bf16.msra.mxu1 %v1127_v53  ;;  %4713 = vmatprep.mubr.msk.bf16.mxu1 %vm4940_vm0, %v4939_v0 }
  0xbd   : > { %4451 = vmatmul.mubr.msk.bf16.vlgmr.msra.gmra.mrb[24].mxu0 %vm414_vm2, %v4446_v51  ;;  %4717 = vmatprep.subr.bf16.mxu1 %v4939_v0 }
  0xbe   : > { %1135 = vmatpush1.bf16.msra.mxu0 %v1125_v55  ;;  %1166 = vmatprep.mubr.bf16.mxu0 %v4941_v1 }
  0xbf   : > { %1238 = vmatprep.subr.bf16.mxu0 %v1230_v56 }
  0xc3   : > { %4714 = vmatmul.mubr.msk.bf16.vlgmr.msra.gmra.mrb[28].mxu1 %vm414_vm2, %v4453_v58 }
  0xc4   : > { %4718 = vmatpush3.bf16.msra.mxu1 %v1231_v60  ;;  %4719 = vmatprep.mubr.msk.bf16.mxu1 %vm4940_vm0, %v4939_v0 }
  0xc5   : > { %4454 = vmatmul.mubr.msk.bf16.vlgmr.msra.gmra.mrb[28].mxu0 %vm414_vm2, %v4453_v58  ;;  %4723 = vmatprep.subr.bf16.mxu1 %v4939_v0 }
  0xc6   : > { %1239 = vmatpush1.bf16.msra.mxu0 %v1229_v61  ;;  %1270 = vmatprep.mubr.bf16.mxu0 %v4941_v1 }
  0xcb   : > { %4720 = vmatmul.mubr.msk.bf16.vlgmr.msra.gmra.mrb[32].mxu1 %vm414_vm2, %v4456_v62 }
  0xcc   : > { %4725 = vmatprep.mubr.msk.bf16.mxu1 %vm4940_vm0, %v4939_v0 }
  0xcd   : > { %4457 = vmatmul.mubr.msk.bf16.vlgmr.msra.gmra.mrb[32].mxu0 %vm414_vm2, %v4456_v62  ;;  %vm1377_vm2 = vcmask 1018880  }
  0xce   : > { %1446 = vmatprep.mubr.bf16.mxu0 %v4941_v1 }
 0x15e   : > { %v493_v5 = vpop.f32.mrb[0].mxu1 }
 0x15f   : > { %v4673_v6 = vpop.f32.mrb[1].mxu1 }
 0x160   : > { %v452_v7 = vpop.f32.mrb[0].mxu0  ;;  %v496_v8 = vpop.f32.mrb[2].mxu1 }
 0x161   : > { %v454_v9 = vpop.f32.mrb[1].mxu0  ;;  %v4674_v10 = vpop.f32.mrb[3].mxu1 }
 0x162   : > { %v456_v11 = vpop.f32.mrb[2].mxu0 }
 0x163   : > { %v457_v12 = vpop.f32.mrb[3].mxu0 }
 0x166   : > { %v580_v13 = vpop.f32.mrb[4].mxu1 }
 0x167   : > { %v581_v14 = vadd.f32 %v580_v13, %v493_v5  ;;  %v4679_v15 = vpop.f32.mrb[5].mxu1 }
 0x168   : > { %v539_v16 = vpop.f32.mrb[4].mxu0  ;;  %v583_v17 = vpop.f32.mrb[6].mxu1 }
 0x169   : > { %v540_v18 = vadd.f32 %v539_v16, %v452_v7  ;;  %v541_v19 = vpop.f32.mrb[5].mxu0  ;;  %v4680_v20 = vpop.f32.mrb[7].mxu1 }
 0x16a   : > { %v542_v21 = vadd.f32 %v541_v19, %v454_v9  ;;  %v543_v22 = vpop.f32.mrb[6].mxu0  ;;  %v1393_v19 = vpop.permute.xlu0 %1392 }
 0x16b   : > { %v544_v23 = vpop.f32.mrb[7].mxu0  ;;  %v1326_v22 = vpop.permute.xlu1 %1325 }
 0x16e   : > { %v678_v24 = vpop.f32.mrb[8].mxu1 }
 0x16f   : > { %v686_v25 = vadd.f32 %v678_v24, %v581_v14  ;;  %v4685_v26 = vpop.f32.mrb[9].mxu1  ;;  %v1397_v24 = vpop.permute.xlu0 %1396 }
 0x170   : > { %v637_v27 = vpop.f32.mrb[8].mxu0  ;;  %v681_v28 = vpop.f32.mrb[10].mxu1 }
 0x171   : > { %v684_v29 = vadd.f32 %v637_v27, %v540_v18  ;;  %v639_v30 = vpop.f32.mrb[9].mxu0  ;;  %v4686_v31 = vpop.f32.mrb[11].mxu1  ;;  %v1412_v28 = vsel %vm1404_vm10, %v1397_v24, 0 }
 0x172   : > { %v685_v32 = vadd.f32 %v639_v30, %v542_v21  ;;  %v641_v33 = vpop.f32.mrb[10].mxu0  ;;  %v1332_v21 = vlaneseq  ;;  %4724 = vmatpush3.bf16.msra.mxu1 %v1412_v28 }
 0x173   : > { %v642_v34 = vpop.f32.mrb[11].mxu0  ;;  %4729 = vmatprep.subr.bf16.mxu1 %v4939_v0 }
 0x174   : > { %v1333_v27 = vshrl.u32 %v1332_v21, 7 }
 0x176   : > { %v779_v35 = vpop.f32.mrb[12].mxu1 }
 0x177   : > { %v787_v36 = vadd.f32 %v779_v35, %v686_v25  ;;  %v4691_v37 = vpop.f32.mrb[13].mxu1 }
 0x178   : > { %v738_v38 = vpop.f32.mrb[12].mxu0  ;;  %v782_v39 = vpop.f32.mrb[14].mxu1 }
 0x179   : > { %v785_v40 = vadd.f32 %v738_v38, %v684_v29  ;;  %v740_v41 = vpop.f32.mrb[13].mxu0  ;;  %v4692_v42 = vpop.f32.mrb[15].mxu1  ;;  %v1342_v38 = vsub.s32 2, %v1333_v27 }
 0x17a   : > { %v786_v43 = vadd.f32 %v740_v41, %v685_v32  ;;  %v742_v44 = vpop.f32.mrb[14].mxu0  ;;  %v381_v41 = vld [vmem:[%s5773_s9] sm:$0x7] }
 0x17b   : > { %v743_v45 = vpop.f32.mrb[15].mxu0 }
 0x17c   : > { %v1338_v45 = vsub.s32 1, %v1333_v27 }
 0x17e   : > { %v880_v46 = vpop.f32.mrb[16].mxu1 }
 0x17f   : > { %v888_v47 = vadd.f32 %v880_v46, %v787_v36  ;;  %v4697_v48 = vpop.f32.mrb[17].mxu1  ;;  %v1395_v36 = vpop.permute.xlu1 %1394 }
 0x180   : > { %v839_v49 = vpop.f32.mrb[16].mxu0  ;;  %v883_v50 = vpop.f32.mrb[18].mxu1  ;;  %v1398_v39 = vsel %vm408_vm1, %v1393_v19, %v1395_v36  ;;  %v5202_v48 = vrot.slane %v381_v41, %v1342_v38 }
 0x181   : > { %v886_v51 = vadd.f32 %v839_v49, %v785_v40  ;;  %v841_v52 = vpop.f32.mrb[17].mxu0  ;;  %v4698_v53 = vpop.f32.mrb[19].mxu1  ;;  %v1399_v40 = vsel %vm408_vm1, %v1395_v36, %v1397_v24  ;;  %v1406_v42 = vsel %vm1404_vm10, %v1398_v39, 0 }
 0x182   : > { %v887_v54 = vadd.f32 %v841_v52, %v786_v43  ;;  %v843_v55 = vpop.f32.mrb[18].mxu0  ;;  %4465 = vmatprep.subr.msk.bf16.mxu0 %vm1404_vm10, %v1399_v40  ;;  %v1334_v43 = vsub.s32 0, %v1333_v27 }
 0x183   : > { %v844_v56 = vpop.f32.mrb[19].mxu0  ;;  %1415 = vmatpush1.bf16.msra.mxu0 %v1406_v42 }
 0x184   : > { %4468 = vmatprep.subr.msk.bf16.mxu0 %vm1404_vm10, %v5187_v4  ;;  %v5204_v52 = vrot.slane %v381_v41, %v1334_v43 }
 0x186   : > { %v981_v57 = vpop.f32.mrb[20].mxu1 }
 0x187   : > { %v989_v58 = vadd.f32 %v981_v57, %v888_v47  ;;  %v4703_v59 = vpop.f32.mrb[21].mxu1  ;;  %v5206_v57 = vrot.slane %v381_v41, %v1338_v45  ;;  %v4475_v41 = vld [vmem:[%s5768_s4 + $0xc] sm:$0xf] }
 0x188   : > { %v940_v60 = vpop.f32.mrb[20].mxu0  ;;  %v984_v61 = vpop.f32.mrb[22].mxu1 }
 0x189   : > { %v987_v62 = vadd.f32 %v940_v60, %v886_v51  ;;  %v942_v63 = vpop.f32.mrb[21].mxu0  ;;  %v4704_v5 = vpop.f32.mrb[23].mxu1 }
 0x18a   : > { %v988_v6 = vadd.f32 %v942_v63, %v887_v54  ;;  %v944_v7 = vpop.f32.mrb[22].mxu0 }
 0x18b   : > { %v945_v8 = vpop.f32.mrb[23].mxu0 }
 0x18c   : > { %v4461_v8 = vld [vmem:[%s5768_s4 + $0x4] sm:$0xf] }
 0x18d   : > { %4466 = vmatmul.mubr.msk.bf16.vlgmr.msra.gmra.mrb[36].mxu0 %vm1400_vm11, %v4461_v8  ;;  %4726 = vmatmul.mubr.msk.bf16.vlgmr.msra.gmra.mrb[36].mxu1 %vm1400_vm11, %v4461_v8 }
 0x18e   : > { %v1105_v9 = vpop.f32.mrb[24].mxu1  ;;  %1539 = vmatprep.mubr.bf16.mxu0 %v4941_v1  ;;  %4731 = vmatprep.mubr.msk.bf16.mxu1 %vm4940_vm0, %v4939_v0 }
 0x18f   : > { %v1113_v10 = vadd.f32 %v1105_v9, %v989_v58  ;;  %v4709_v11 = vpop.f32.mrb[25].mxu1  ;;  %v1499_v9 = vsel %vm1404_vm10, %v5178_v2, 0 }
 0x190   : > { %v1064_v12 = vpop.f32.mrb[24].mxu0  ;;  %v1108_v13 = vpop.f32.mrb[26].mxu1  ;;  %1508 = vmatpush1.bf16.msra.mxu0 %v1499_v9  ;;  %v1505_v11 = vsel %vm1404_vm10, %v5183_v3, 0 }
 0x191   : > { %v1111_v14 = vadd.f32 %v1064_v12, %v987_v62  ;;  %v1066_v15 = vpop.f32.mrb[25].mxu0  ;;  %v4710_v16 = vpop.f32.mrb[27].mxu1  ;;  %4730 = vmatpush3.bf16.msra.mxu1 %v1505_v11  ;;  %v2015_v12 = vld [vmem:[%s5175_s30 + $0x8] sm:$0xff] }
 0x192   : > { %v1112_v17 = vadd.f32 %v1066_v15, %v988_v6  ;;  %v1068_v18 = vpop.f32.mrb[26].mxu0  ;;  %4735 = vmatprep.subr.bf16.mxu1 %v4939_v0  ;;  %v4491_v13 = vcombine.high %v2015_v12, %v2015_v12 }
 0x193   : > { %v1069_v20 = vpop.f32.mrb[27].mxu0 }
 0x196   : > { %v1209_v23 = vpop.f32.mrb[28].mxu1 }
 0x197   : > { %v1217_v25 = vadd.f32 %v1209_v23, %v1113_v10  ;;  %v4715_v26 = vpop.f32.mrb[29].mxu1  ;;  %v1379_v10 = vld [vmem:[%s5768_s4] sm:$0xf] }
 0x198   : > { %v1168_v29 = vpop.f32.mrb[28].mxu0  ;;  %v1212_v30 = vpop.f32.mrb[30].mxu1  ;;  %4469 = vmatmul.mubr.msk.bf16.vlgmr.msra.gmra.mrb[40].mxu0 %vm1400_vm11, %v1379_v10  ;;  %4732 = vmatmul.mubr.msk.bf16.vlgmr.msra.gmra.mrb[40].mxu1 %vm1400_vm11, %v1379_v10 }
 0x199   : > { %v1215_v31 = vadd.f32 %v1168_v29, %v1111_v14  ;;  %v1170_v32 = vpop.f32.mrb[29].mxu0  ;;  %v4716_v33 = vpop.f32.mrb[31].mxu1  ;;  %1642 = vmatprep.mubr.bf16.mxu0 %v4941_v1  ;;  %4737 = vmatprep.mubr.msk.bf16.mxu1 %vm4940_vm0, %v4939_v0  ;;  %v4490_v14 = vcombine.low %v2015_v12, %v2015_v12  ;;  %v4471_v30 = vld [vmem:[%s5768_s4 + $0x8] sm:$0xf] }
 0x19a   : > { %v1216_v34 = vadd.f32 %v1170_v32, %v1112_v17  ;;  %v1172_v35 = vpop.f32.mrb[30].mxu0 }
 0x19b   : > { %v1173_v37 = vpop.f32.mrb[31].mxu0 }
 0x19e   : > { %v1313_v44 = vpop.f32.mrb[32].mxu1 }
 0x19f   : > { %v1321_v46 = vadd.f32 %v1313_v44, %v1217_v25  ;;  %v4721_v47 = vpop.f32.mrb[33].mxu1 }
 0x1a0   : > { %v1272_v49 = vpop.f32.mrb[32].mxu0  ;;  %v1316_v50 = vpop.f32.mrb[34].mxu1 }
 0x1a1   : > { %v1319_v51 = vadd.f32 %v1272_v49, %v1215_v31  ;;  %v1330_v53 = vadd.f32 %v1326_v22, %v1321_v46  ;;  %v1274_v54 = vpop.f32.mrb[33].mxu0  ;;  %v4722_v55 = vpop.f32.mrb[35].mxu1 }
 0x1a2   : > { %v1320_v56 = vadd.f32 %v1274_v54, %v1216_v34  ;;  %v1276_v58 = vpop.f32.mrb[34].mxu0 }
 0x1a3   : > { %v1328_v59 = vadd.f32 %v1326_v22, %v1319_v51  ;;  %v1277_v60 = vpop.f32.mrb[35].mxu0  ;;  %v1349_v61 = vmul.f32 %v5202_v48, %v1330_v53  ;;  %v4479_v53 = vld [vmem:[%s5768_s4 + $0x10] sm:$0xf] }
 0x1a4   : > { %v1329_v62 = vadd.f32 %v1326_v22, %v1320_v56 }
 0x1a5   : > { %v1347_v63 = vmul.f32 %v5204_v52, %v1328_v59  ;;  %v4594_v5 = vpack.c.bf16 %v1349_v61, %v1349_v61 }
 0x1a6   : > { %v1348_v6 = vmul.f32 %v5206_v57, %v1329_v62 }
 0x1a7   : > { %1365 = vrot.lane.b32.xlu0 %v4594_v5, %s4950_s15  ;;  %v4483_v5 = vld [vmem:[%s5768_s4 + $0x14] sm:$0xf] }
 0x1a8   : > { %v4593_v7 = vpack.c.bf16 %v1348_v6, %v1347_v63 }
 0x1aa   : > { %1363 = vrot.lane.b32.xlu1 %v4593_v7, %s4950_s15 }
 0x1ab   : > { %1592 = vrot.lane.b32.xlu0 %v5187_v4, %s4943_s20 }
 0x1ae   : > { %1590 = vrot.lane.b32.xlu1 %v5178_v2, %s4943_s20 }
 0x1af   : > { %1696 = vrot.lane.b32.xlu0 %v5178_v2, %s4944_s21 }
 0x1b2   : > { %1594 = vrot.lane.b32.xlu1 %v5183_v3, %s4943_s20 }
 0x1b3   : > { %1700 = vrot.lane.b32.xlu0 %v5183_v3, %s4944_s21 }
 0x1b6   : > { %1698 = vrot.lane.b32.xlu1 %v5187_v4, %s4944_s21 }
 0x1b7   : > { %1804 = vrot.lane.b32.xlu0 %v5187_v4, %s4945_s22 }
 0x1ba   : > { %1802 = vrot.lane.b32.xlu1 %v5178_v2, %s4945_s22 }
 0x1bb   : > { %1908 = vrot.lane.b32.xlu0 %v5178_v2, %s4946_s23 }
 0x1be   : > { %1806 = vrot.lane.b32.xlu1 %v5183_v3, %s4945_s22 }
 0x1bf   : > { %1912 = vrot.lane.b32.xlu0 %v5183_v3, %s4946_s23 }
 0x1c2   : > { %1910 = vrot.lane.b32.xlu1 %v5187_v4, %s4946_s23 }
 0x1c3   : > { %2028 = vrot.lane.b32.xlu0 %v5187_v4, %s4947_s24 }
 0x1c6   : > { %2026 = vrot.lane.b32.xlu1 %v5178_v2, %s4947_s24 }
 0x1c7   : > { %2032 = vrot.lane.b32.xlu0 %v4491_v13, %s4947_s24 }
 0x1ca   : > { %2030 = vrot.lane.b32.xlu1 %v4490_v14, %s4947_s24 }
 0x1cb   : > { %2137 = vrot.lane.b32.xlu0 %v5187_v4, %s4948_s25 }
 0x1ce   : > { %2135 = vrot.lane.b32.xlu1 %v5178_v2, %s4948_s25 }
 0x1cf   : > { %2141 = vrot.lane.b32.xlu0 %v4491_v13, %s4948_s25 }
 0x1d2   : > { %2139 = vrot.lane.b32.xlu1 %v4490_v14, %s4948_s25 }
 0x1d3   : > { %2246 = vrot.lane.b32.xlu0 %v5187_v4, %s4949_s26 }
 0x1d6   : > { %2244 = vrot.lane.b32.xlu1 %v5178_v2, %s4949_s26 }
 0x1d7   : > { %2250 = vrot.lane.b32.xlu0 %v4491_v13, %s4949_s26 }
 0x1da   : > { %2248 = vrot.lane.b32.xlu1 %v4490_v14, %s4949_s26 }
 0x219   : > { %v1366_v3 = vpop.permute.xlu0 %1365 }
 0x21c   : > { %v1364_v15 = vpop.permute.xlu1 %1363 }
 0x21d   : > { %v1367_v17 = vrot.slane %v1364_v15, 4  ;;  %v1593_v18 = vpop.permute.xlu0 %1592 }
 0x21f   : > { %v1369_v4 = vsel %vm1368_vm14, %v1367_v17, %v1364_v15  ;;  %v1370_v2 = vsel %vm1368_vm14, %v1367_v17, %v1366_v3  ;;  %v4487_v17 = vld [vmem:[%s5768_s4 + $0x18] sm:$0xf] }
 0x220   : > { %1376 = vst.msk [vmem:[#allocation2] sm:$0xff] %vm5277_vm15, %v1369_v4  ;;  %v1591_v19 = vpop.permute.xlu1 %1590 }
 0x221   : > { %1378 = vst.msk [vmem:[#allocation2 + $0x8] sm:$0xf] %vm1377_vm2, %v1370_v2  ;;  %v1596_v20 = vsel %vm594_vm3, %v1591_v19, %v1593_v18  ;;  %v1697_v21 = vpop.permute.xlu0 %1696 }
 0x222   : > { %v1602_v22 = vsel %vm1404_vm10, %v1596_v20, 0 }
 0x224   : > { %v1595_v23 = vpop.permute.xlu1 %1594 }
 0x225   : > { %v1597_v24 = vsel %vm594_vm3, %v1593_v18, %v1595_v23  ;;  %v1608_v25 = vsel %vm1404_vm10, %v1595_v23, 0  ;;  %v1701_v26 = vpop.permute.xlu0 %1700 }
 0x226   : > { %4472 = vmatprep.subr.msk.bf16.mxu0 %vm1404_vm10, %v1597_v24  ;;  %4736 = vmatpush3.bf16.msra.mxu1 %v1608_v25  ;;  %v1714_v35 = vsel %vm1404_vm10, %v1701_v26, 0 }
 0x227   : > { %v2352_v27 = vld [vmem:[#allocation2] sm:$0xff]  ;;  %1611 = vmatpush1.bf16.msra.mxu0 %v1602_v22  ;;  %4741 = vmatprep.subr.bf16.mxu1 %v4939_v0 }
 0x228   : > { %v5292_v28 = vcombine.high %v2352_v27, %v2352_v27  ;;  %v5294_v29 = vcombine.low %v2352_v27, %v2352_v27  ;;  %v1699_v31 = vpop.permute.xlu1 %1698  ;;  %v5310_v37 = vld [vmem:[#allocation2 + $0x8] ss:$0 sps:$4 sm:$0xff]   ;;  %v5422_v27 = vld [vmem:[#allocation3] sm:$0xff] }
 0x229   : > { %v1702_v32 = vsel %vm695_vm4, %v1697_v21, %v1699_v31  ;;  %v1703_v33 = vsel %vm695_vm4, %v1699_v31, %v1701_v26  ;;  %4738 = vmatmul.mubr.msk.bf16.vlgmr.msra.gmra.mrb[44].mxu1 %vm1400_vm11, %v4471_v30  ;;  %v1805_v34 = vpop.permute.xlu0 %1804  ;;  %v2985_v11 = vld [vmem:[#allocation2 + $0x8] sm:$0xff] }
 0x22a   : > { %2366 = vrot.lane.b32.xlu0 %v5292_v28, %s4942_s19  ;;  %2364 = vrot.lane.b32.xlu1 %v5294_v29, %s4942_s19  ;;  %v1708_v36 = vsel %vm1404_vm10, %v1702_v32, 0  ;;  %v4532_v15 = vcombine.low %v2985_v11, %v2985_v11  ;;  %v4533_v20 = vcombine.high %v2985_v11, %v2985_v11 }
 0x22b   : > { %4473 = vmatmul.mubr.msk.bf16.vlgmr.msra.gmra.mrb[44].mxu0 %vm1400_vm11, %v4471_v30  ;;  %4476 = vmatprep.subr.msk.bf16.mxu0 %vm1404_vm10, %v1703_v33  ;;  %v4499_v30 = vld [vmem:[%s5768_s4 + $0x20] sm:$0xf] }
 0x22c   : > { %1717 = vmatpush1.bf16.msra.mxu0 %v1708_v36  ;;  %v1803_v38 = vpop.permute.xlu1 %1802  ;;  %1748 = vmatprep.mubr.bf16.mxu0 %v4941_v1 }
 0x22d   : > { %4742 = vmatpush3.bf16.msra.mxu1 %v1714_v35  ;;  %v1909_v39 = vpop.permute.xlu0 %1908  ;;  %4743 = vmatprep.mubr.msk.bf16.mxu1 %vm4940_vm0, %v4939_v0  ;;  %v1808_v40 = vsel %vm796_vm5, %v1803_v38, %v1805_v34 }
 0x22e   : > { %2560 = vrot.lane.b32.xlu0 %v5294_v29, %s4943_s20  ;;  %2368 = vrot.lane.b32.xlu1 %v5310_v37, %s4942_s19  ;;  %v1814_v43 = vsel %vm1404_vm10, %v1808_v40, 0 }
 0x22f   : > { %4747 = vmatprep.subr.bf16.mxu1 %v4939_v0 }
 0x230   : > { %v1807_v42 = vpop.permute.xlu1 %1806 }
 0x231   : > { %v1809_v44 = vsel %vm796_vm5, %v1805_v34, %v1807_v42  ;;  %4744 = vmatmul.mubr.msk.bf16.vlgmr.msra.gmra.mrb[48].mxu1 %vm1400_vm11, %v4475_v41  ;;  %v1913_v45 = vpop.permute.xlu0 %1912  ;;  %v1820_v46 = vsel %vm1404_vm10, %v1807_v42, 0 }
 0x232   : > { %2564 = vrot.lane.b32.xlu0 %v5310_v37, %s4943_s20  ;;  %2562 = vrot.lane.b32.xlu1 %v5292_v28, %s4943_s20  ;;  %v1926_v54 = vsel %vm1404_vm10, %v1913_v45, 0 }
 0x233   : > { %4477 = vmatmul.mubr.msk.bf16.vlgmr.msra.gmra.mrb[48].mxu0 %vm1400_vm11, %v4475_v41  ;;  %4480 = vmatprep.subr.msk.bf16.mxu0 %vm1404_vm10, %v1809_v44 }
 0x234   : > { %1823 = vmatpush1.bf16.msra.mxu0 %v1814_v43  ;;  %1854 = vmatprep.mubr.bf16.mxu0 %v4941_v1  ;;  %v1911_v47 = vpop.permute.xlu1 %1910 }
 0x235   : > { %v1915_v49 = vsel %vm897_vm6, %v1911_v47, %v1913_v45  ;;  %4748 = vmatpush3.bf16.msra.mxu1 %v1820_v46  ;;  %4749 = vmatprep.mubr.msk.bf16.mxu1 %vm4940_vm0, %v4939_v0  ;;  %v2029_v50 = vpop.permute.xlu0 %2028  ;;  %v1914_v51 = vsel %vm897_vm6, %v1909_v39, %v1911_v47 }
 0x236   : > { %2668 = vrot.lane.b32.xlu0 %v5292_v28, %s4944_s21  ;;  %2666 = vrot.lane.b32.xlu1 %v5294_v29, %s4944_s21  ;;  %v1920_v56 = vsel %vm1404_vm10, %v1914_v51, 0 }
 0x237   : > { %4484 = vmatprep.subr.msk.bf16.mxu0 %vm1404_vm10, %v1915_v49  ;;  %4753 = vmatprep.subr.bf16.mxu1 %v4939_v0 }
 0x238   : > { %v2027_v55 = vpop.permute.xlu1 %2026 }
 0x239   : > { %4750 = vmatmul.mubr.msk.bf16.vlgmr.msra.gmra.mrb[52].mxu1 %vm1400_vm11, %v4479_v53  ;;  %v2033_v58 = vpop.permute.xlu0 %2032  ;;  %v2034_v63 = vsel %vm1020_vm7, %v2027_v55, %v2029_v50 }
 0x23a   : > { %2772 = vrot.lane.b32.xlu0 %v5294_v29, %s4945_s22  ;;  %2670 = vrot.lane.b32.xlu1 %v5310_v37, %s4944_s21  ;;  %v2041_v8 = vsel %vm1404_vm10, %v2034_v63, 0 }
 0x23b   : > { %4481 = vmatmul.mubr.msk.bf16.vlgmr.msra.gmra.mrb[52].mxu0 %vm1400_vm11, %v4479_v53  ;;  %4754 = vmatpush3.bf16.msra.mxu1 %v1926_v54 }
 0x23c   : > { %1929 = vmatpush1.bf16.msra.mxu0 %v1920_v56  ;;  %1960 = vmatprep.mubr.bf16.mxu0 %v4941_v1  ;;  %v2031_v59 = vpop.permute.xlu1 %2030 }
 0x23d   : > { %v2035_v60 = vsel %vm1020_vm7, %v2029_v50, %v2031_v59  ;;  %v2036_v61 = vsel %vm1020_vm7, %v2031_v59, %v2033_v58  ;;  %4755 = vmatprep.mubr.msk.bf16.mxu1 %vm4940_vm0, %v4939_v0  ;;  %v2138_v62 = vpop.permute.xlu0 %2137  ;;  %4759 = vmatprep.subr.bf16.mxu1 %v4939_v0 }
 0x23e   : > { %2776 = vrot.lane.b32.xlu0 %v5310_v37, %s4945_s22  ;;  %2774 = vrot.lane.b32.xlu1 %v5292_v28, %s4945_s22  ;;  %v2047_v6 = vsel %vm1404_vm10, %v2036_v61, 0 }
 0x23f   : > { %4492 = vmatprep.subr.msk.bf16.mxu0 %vm1404_vm10, %v2035_v60 }
 0x240   : > { %v2136_v7 = vpop.permute.xlu1 %2135 }
 0x241   : > { %4756 = vmatmul.mubr.msk.bf16.vlgmr.msra.gmra.mrb[56].mxu1 %vm1400_vm11, %v4483_v5  ;;  %v2142_v9 = vpop.permute.xlu0 %2141  ;;  %v2143_v14 = vsel %vm1124_vm8, %v2136_v7, %v2138_v62  ;;  %v2469_v7 = vsel %vm1404_vm10, %v5294_v29, 0 }
 0x242   : > { %2880 = vrot.lane.b32.xlu0 %v5292_v28, %s4946_s23  ;;  %2878 = vrot.lane.b32.xlu1 %v5294_v29, %s4946_s23  ;;  %v2150_v2 = vsel %vm1404_vm10, %v2143_v14, 0 }
 0x243   : > { %4485 = vmatmul.mubr.msk.bf16.vlgmr.msra.gmra.mrb[56].mxu0 %vm1400_vm11, %v4483_v5  ;;  %4760 = vmatpush3.bf16.msra.mxu1 %v2047_v6  ;;  %v2475_v6 = vsel %vm1404_vm10, %v5310_v37, 0 }
 0x244   : > { %2050 = vmatpush1.bf16.msra.mxu0 %v2041_v8  ;;  %2081 = vmatprep.mubr.bf16.mxu0 %v4941_v1  ;;  %v2140_v10 = vpop.permute.xlu1 %2139 }
 0x245   : > { %v2144_v12 = vsel %vm1124_vm8, %v2138_v62, %v2140_v10  ;;  %v2145_v13 = vsel %vm1124_vm8, %v2140_v10, %v2142_v9  ;;  %4761 = vmatprep.mubr.msk.bf16.mxu1 %vm4940_vm0, %v4939_v0  ;;  %4765 = vmatprep.subr.bf16.mxu1 %v4939_v0  ;;  %v2247_v3 = vpop.permute.xlu0 %2246  ;;  %v4503_v62 = vld [vmem:[%s5769_s5 + $0x4] sm:$0xf] }
 0x246   : > { %2996 = vrot.lane.b32.xlu0 %v5294_v29, %s4947_s24  ;;  %2882 = vrot.lane.b32.xlu1 %v5310_v37, %s4946_s23  ;;  %v2156_v18 = vsel %vm1404_vm10, %v2145_v13, 0  ;;  %v3324_v37 = vld [vmem:[%s5770_s6] sm:$0xff] }
 0x247   : > { %4496 = vmatprep.subr.msk.bf16.mxu0 %vm1404_vm10, %v2144_v12 }
 0x248   : > { %v2245_v4 = vpop.permute.xlu1 %2244 }
 0x249   : > { %4762 = vmatmul.mubr.msk.bf16.vlgmr.msra.gmra.mrb[60].mxu1 %vm1400_vm11, %v4487_v17  ;;  %v2251_v19 = vpop.permute.xlu0 %2250  ;;  %v2252_v24 = vsel %vm1228_vm9, %v2245_v4, %v2247_v3 }
 0x24a   : > { %3000 = vrot.lane.b32.xlu0 %v4532_v15, %s4947_s24  ;;  %2998 = vrot.lane.b32.xlu1 %v5292_v28, %s4947_s24  ;;  %v2259_v26 = vsel %vm1404_vm10, %v2252_v24, 0 }
 0x24b   : > { %4493 = vmatmul.mubr.msk.bf16.vlgmr.msra.gmra.mrb[60].mxu0 %vm1400_vm11, %v4487_v17  ;;  %4766 = vmatpush3.bf16.msra.mxu1 %v2156_v18  ;;  %v4513_v18 = vld [vmem:[%s5769_s5 + $0x8] sm:$0xf] }
 0x24c   : > { %2159 = vmatpush1.bf16.msra.mxu0 %v2150_v2  ;;  %2190 = vmatprep.mubr.bf16.mxu0 %v4941_v1  ;;  %v2249_v21 = vpop.permute.xlu1 %2248  ;;  %v4495_v1 = vld [vmem:[%s5768_s4 + $0x1c] sm:$0xf] }
 0x24d   : > { %v2253_v22 = vsel %vm1228_vm9, %v2247_v3, %v2249_v21  ;;  %4767 = vmatprep.mubr.msk.bf16.mxu1 %vm4940_vm0, %v4939_v0  ;;  %v2254_v23 = vsel %vm1228_vm9, %v2249_v21, %v2251_v19  ;;  %4771 = vmatprep.subr.bf16.mxu1 %v4939_v0 }
 0x24e   : > { %3105 = vrot.lane.b32.xlu0 %v5294_v29, %s4948_s25  ;;  %3002 = vrot.lane.b32.xlu1 %v4533_v20, %s4947_s24  ;;  %v2265_v25 = vsel %vm1404_vm10, %v2254_v23, 0 }
 0x24f   : > { %4500 = vmatprep.subr.msk.bf16.mxu0 %vm1404_vm10, %v2253_v22 }
 0x251   : > { %4768 = vmatmul.mubr.msk.bf16.vlgmr.msra.gmra.mrb[64].mxu1 %vm1400_vm11, %v4495_v1 }
 0x252   : > { %3109 = vrot.lane.b32.xlu0 %v4532_v15, %s4948_s25  ;;  %3107 = vrot.lane.b32.xlu1 %v5292_v28, %s4948_s25 }
 0x253   : > { %4497 = vmatmul.mubr.msk.bf16.vlgmr.msra.gmra.mrb[64].mxu0 %vm1400_vm11, %v4495_v1  ;;  %4772 = vmatpush3.bf16.msra.mxu1 %v2265_v25  ;;  %v4517_v1 = vld [vmem:[%s5769_s5 + $0xc] sm:$0xf] }
 0x254   : > { %2268 = vmatpush1.bf16.msra.mxu0 %v2259_v26  ;;  %2299 = vmatprep.mubr.bf16.mxu0 %v5422_v27 }
 0x255   : > { %4773 = vmatprep.mubr.msk.bf16.mxu1 %vm4940_vm0, %v4939_v0  ;;  %4777 = vmatprep.subr.bf16.mxu1 %v4939_v0 }
 0x256   : > { %3214 = vrot.lane.b32.xlu0 %v5294_v29, %s4949_s26  ;;  %3111 = vrot.lane.b32.xlu1 %v4533_v20, %s4948_s25  ;;  %v2351_v29 = vld [vmem:[%s5769_s5] sm:$0xf] }
 0x259   : > { %4774 = vmatmul.mubr.msk.bf16.vlgmr.msra.gmra.mrb[68].mxu1 %vm1400_vm11, %v4499_v30 }
 0x25a   : > { %3218 = vrot.lane.b32.xlu0 %v4532_v15, %s4949_s26  ;;  %3216 = vrot.lane.b32.xlu1 %v5292_v28, %s4949_s26 }
 0x25b   : > { %4501 = vmatmul.mubr.msk.bf16.vlgmr.msra.gmra.mrb[68].mxu0 %vm1400_vm11, %v4499_v30  ;;  %4779 = vmatprep.mubr.msk.bf16.mxu1 %vm4940_vm0, %v4939_v0 }
 0x25c   : > { %2416 = vmatprep.mubr.bf16.mxu0 %v5422_v27 }
 0x25e   : > { %3220 = vrot.lane.b32.xlu1 %v4533_v20, %s4949_s26  ;;  %3327 = vperm.xlu0 %4907, %v3324_v37  }
 0x260   : > { %v1448_v31 = vpop.f32.mrb[36].mxu0  ;;  %v1489_v33 = vpop.f32.mrb[36].mxu1 }
 0x261   : > { %v1450_v32 = vpop.f32.mrb[37].mxu0  ;;  %v4727_v35 = vpop.f32.mrb[37].mxu1 }
 0x262   : > { %v1452_v34 = vpop.f32.mrb[38].mxu0  ;;  %v1492_v38 = vpop.f32.mrb[38].mxu1 }
 0x263   : > { %v1453_v36 = vpop.f32.mrb[39].mxu0  ;;  %v4728_v39 = vpop.f32.mrb[39].mxu1 }
 0x264   : > { %v4521_v36 = vld [vmem:[%s5769_s5 + $0x10] sm:$0xf] }
 0x26b   : > { %v1541_v40 = vpop.f32.mrb[40].mxu0  ;;  %v1582_v46 = vpop.f32.mrb[40].mxu1 }
 0x26c   : > { %v5443_v41 = vadd.f32 %v1541_v40, %v1448_v31  ;;  %v1543_v42 = vpop.f32.mrb[41].mxu0  ;;  %v5447_v47 = vadd.f32 %v1582_v46, %v1489_v33  ;;  %v4733_v49 = vpop.f32.mrb[41].mxu1 }
 0x26d   : > { %v5445_v43 = vadd.f32 %v1543_v42, %v1450_v32  ;;  %v1545_v44 = vpop.f32.mrb[42].mxu0  ;;  %v1585_v50 = vpop.f32.mrb[42].mxu1  ;;  %v4525_v49 = vld [vmem:[%s5769_s5 + $0x14] sm:$0xf] }
 0x26e   : > { %v1546_v45 = vpop.f32.mrb[43].mxu0  ;;  %v4734_v51 = vpop.f32.mrb[43].mxu1 }
 0x29c   : > { %v2367_v53 = vpop.permute.xlu0 %2366  ;;  %v2365_v54 = vpop.permute.xlu1 %2364 }
 0x29d   : > { %v2370_v55 = vsel %vm408_vm1, %v2365_v54, %v2367_v53 }
 0x29e   : > { %v2376_v61 = vsel %vm1404_vm10, %v2370_v55, 0 }
 0x2a0   : > { %v2561_v56 = vpop.permute.xlu0 %2560  ;;  %v2369_v58 = vpop.permute.xlu1 %2368 }
 0x2a1   : > { %v2371_v59 = vsel %vm408_vm1, %v2367_v53, %v2369_v58  ;;  %v2382_v60 = vsel %vm1404_vm10, %v2369_v58, 0 }
 0x2a2   : > { %4507 = vmatprep.subr.msk.bf16.mxu0 %vm1404_vm10, %v2371_v59  ;;  %4778 = vmatpush3.bf16.msra.mxu1 %v2382_v60  ;;  %v4529_v60 = vld [vmem:[%s5769_s5 + $0x18] sm:$0xf] }
 0x2a3   : > { %2385 = vmatpush1.bf16.msra.mxu0 %v2376_v61  ;;  %4783 = vmatprep.subr.bf16.mxu1 %v4939_v0 }
 0x2a4   : > { %v2565_v63 = vpop.permute.xlu0 %2564  ;;  %4510 = vmatprep.subr.msk.bf16.mxu0 %vm1404_vm10, %v5292_v28  ;;  %v2563_v5 = vpop.permute.xlu1 %2562 }
 0x2a5   : > { %4780 = vmatmul.mubr.msk.bf16.vlgmr.msra.gmra.mrb[72].mxu1 %vm1400_vm11, %v4503_v62  ;;  %v2567_v8 = vsel %vm594_vm3, %v2563_v5, %v2565_v63  ;;  %v2566_v10 = vsel %vm594_vm3, %v2561_v56, %v2563_v5  ;;  %v2578_v13 = vsel %vm1404_vm10, %v2565_v63, 0 }
 0x2a6   : > { %4508 = vmatmul.mubr.msk.bf16.vlgmr.msra.gmra.mrb[72].mxu0 %vm1400_vm11, %v4503_v62  ;;  %4784 = vmatpush3.bf16.msra.mxu1 %v2475_v6  ;;  %v2572_v3 = vsel %vm1404_vm10, %v2566_v10, 0  ;;  %v4541_v10 = vld [vmem:[%s5769_s5 + $0x20] sm:$0xf] }
 0x2a7   : > { %2478 = vmatpush1.bf16.msra.mxu0 %v2469_v7  ;;  %4785 = vmatprep.mubr.msk.bf16.mxu1 %vm4940_vm0, %v4939_v0 }
 0x2a8   : > { %v2669_v9 = vpop.permute.xlu0 %2668  ;;  %4514 = vmatprep.subr.msk.bf16.mxu0 %vm1404_vm10, %v2567_v8  ;;  %v2667_v28 = vpop.permute.xlu1 %2666  ;;  %4789 = vmatprep.subr.bf16.mxu1 %v4939_v0 }
 0x2a9   : > { %2509 = vmatprep.mubr.bf16.mxu0 %v5422_v27  ;;  %v2672_v4 = vsel %vm695_vm4, %v2667_v28, %v2669_v9 }
 0x2aa   : > { %v2678_v21 = vsel %vm1404_vm10, %v2672_v4, 0 }
 0x2ac   : > { %v2773_v11 = vpop.permute.xlu0 %2772  ;;  %v2671_v12 = vpop.permute.xlu1 %2670 }
 0x2ad   : > { %v2673_v14 = vsel %vm695_vm4, %v2669_v9, %v2671_v12  ;;  %4786 = vmatmul.mubr.msk.bf16.vlgmr.msra.gmra.mrb[76].mxu1 %vm1400_vm11, %v2351_v29  ;;  %v2684_v20 = vsel %vm1404_vm10, %v2671_v12, 0  ;;  %v4537_v9 = vld [vmem:[%s5769_s5 + $0x1c] sm:$0xf] }
 0x2ae   : > { %4790 = vmatpush3.bf16.msra.mxu1 %v2578_v13  ;;  %4511 = vmatmul.mubr.msk.bf16.vlgmr.msra.gmra.mrb[76].mxu0 %vm1400_vm11, %v2351_v29 }
 0x2af   : > { %2581 = vmatpush1.bf16.msra.mxu0 %v2572_v3  ;;  %4791 = vmatprep.mubr.msk.bf16.mxu1 %vm4940_vm0, %v4939_v0 }
 0x2b0   : > { %4518 = vmatprep.subr.msk.bf16.mxu0 %vm1404_vm10, %v2673_v14  ;;  %v2777_v15 = vpop.permute.xlu0 %2776  ;;  %v2775_v17 = vpop.permute.xlu1 %2774  ;;  %4795 = vmatprep.subr.bf16.mxu1 %v4939_v0 }
 0x2b1   : > { %2612 = vmatprep.mubr.bf16.mxu0 %v5422_v27  ;;  %v2779_v22 = vsel %vm796_vm5, %v2775_v17, %v2777_v15  ;;  %v2778_v25 = vsel %vm796_vm5, %v2773_v11, %v2775_v17  ;;  %v2790_v31 = vsel %vm1404_vm10, %v2777_v15, 0 }
 0x2b2   : > { %v2784_v32 = vsel %vm1404_vm10, %v2778_v25, 0 }
 0x2b4   : > { %v2881_v2 = vpop.permute.xlu0 %2880  ;;  %v2879_v19 = vpop.permute.xlu1 %2878 }
 0x2b5   : > { %4792 = vmatmul.mubr.msk.bf16.vlgmr.msra.gmra.mrb[80].mxu1 %vm1400_vm11, %v4513_v18  ;;  %v2884_v38 = vsel %vm897_vm6, %v2879_v19, %v2881_v2 }
 0x2b6   : > { %4796 = vmatpush3.bf16.msra.mxu1 %v2684_v20  ;;  %4515 = vmatmul.mubr.msk.bf16.vlgmr.msra.gmra.mrb[80].mxu0 %vm1400_vm11, %v4513_v18  ;;  %v2890_v42 = vsel %vm1404_vm10, %v2884_v38, 0 }
 0x2b7   : > { %2687 = vmatpush1.bf16.msra.mxu0 %v2678_v21  ;;  %4797 = vmatprep.mubr.msk.bf16.mxu1 %vm4940_vm0, %v4939_v0 }
 0x2b8   : > { %4522 = vmatprep.subr.msk.bf16.mxu0 %vm1404_vm10, %v2779_v22  ;;  %v2997_v23 = vpop.permute.xlu0 %2996  ;;  %v2883_v24 = vpop.permute.xlu1 %2882  ;;  %4801 = vmatprep.subr.bf16.mxu1 %v4939_v0 }
 0x2b9   : > { %2718 = vmatprep.mubr.bf16.mxu0 %v5422_v27  ;;  %v2885_v33 = vsel %vm897_vm6, %v2881_v2, %v2883_v24  ;;  %v2896_v39 = vsel %vm1404_vm10, %v2883_v24, 0 }
 0x2bc   : > { %v3001_v26 = vpop.permute.xlu0 %3000  ;;  %v2999_v30 = vpop.permute.xlu1 %2998 }
 0x2bd   : > { %4798 = vmatmul.mubr.msk.bf16.vlgmr.msra.gmra.mrb[84].mxu1 %vm1400_vm11, %v4517_v1  ;;  %v3005_v44 = vsel %vm1020_vm7, %v2999_v30, %v3001_v26  ;;  %v3004_v50 = vsel %vm1020_vm7, %v2997_v23, %v2999_v30 }
 0x2be   : > { %4802 = vmatpush3.bf16.msra.mxu1 %v2790_v31  ;;  %4519 = vmatmul.mubr.msk.bf16.vlgmr.msra.gmra.mrb[84].mxu0 %vm1400_vm11, %v4517_v1  ;;  %v3011_v54 = vsel %vm1404_vm10, %v3004_v50, 0 }
 0x2bf   : > { %2793 = vmatpush1.bf16.msra.mxu0 %v2784_v32  ;;  %4803 = vmatprep.mubr.msk.bf16.mxu1 %vm4940_vm0, %v4939_v0 }
 0x2c0   : > { %4526 = vmatprep.subr.msk.bf16.mxu0 %vm1404_vm10, %v2885_v33  ;;  %v3003_v34 = vpop.permute.xlu1 %3002  ;;  %4807 = vmatprep.subr.bf16.mxu1 %v4939_v0  ;;  %v3106_v35 = vpop.permute.xlu0 %3105 }
 0x2c1   : > { %2824 = vmatprep.mubr.bf16.mxu0 %v5422_v27  ;;  %v3006_v46 = vsel %vm1020_vm7, %v3001_v26, %v3003_v34 }
 0x2c2   : > { %v3017_v53 = vsel %vm1404_vm10, %v3006_v46, 0 }
 0x2c4   : > { %v3108_v40 = vpop.permute.xlu1 %3107  ;;  %v3110_v45 = vpop.permute.xlu0 %3109 }
 0x2c5   : > { %4804 = vmatmul.mubr.msk.bf16.vlgmr.msra.gmra.mrb[88].mxu1 %vm1400_vm11, %v4521_v36  ;;  %v3114_v56 = vsel %vm1124_vm8, %v3108_v40, %v3110_v45  ;;  %v3113_v61 = vsel %vm1124_vm8, %v3106_v35, %v3108_v40 }
 0x2c6   : > { %4808 = vmatpush3.bf16.msra.mxu1 %v2896_v39  ;;  %4523 = vmatmul.mubr.msk.bf16.vlgmr.msra.gmra.mrb[88].mxu0 %vm1400_vm11, %v4521_v36  ;;  %v3120_v5 = vsel %vm1404_vm10, %v3113_v61, 0 }
 0x2c7   : > { %2899 = vmatpush1.bf16.msra.mxu0 %v2890_v42  ;;  %4809 = vmatprep.mubr.msk.bf16.mxu1 %vm4940_vm0, %v4939_v0 }
 0x2c8   : > { %4534 = vmatprep.subr.msk.bf16.mxu0 %vm1404_vm10, %v3005_v44  ;;  %4813 = vmatprep.subr.bf16.mxu1 %v4939_v0  ;;  %v3112_v51 = vpop.permute.xlu1 %3111  ;;  %v3215_v55 = vpop.permute.xlu0 %3214 }
 0x2c9   : > { %2930 = vmatprep.mubr.bf16.mxu0 %v5422_v27  ;;  %v3115_v59 = vsel %vm1124_vm8, %v3110_v45, %v3112_v51 }
 0x2ca   : > { %v3126_v63 = vsel %vm1404_vm10, %v3115_v59, 0 }
 0x2cc   : > { %v3217_v58 = vpop.permute.xlu1 %3216  ;;  %v3219_v62 = vpop.permute.xlu0 %3218 }
 0x2cd   : > { %4810 = vmatmul.mubr.msk.bf16.vlgmr.msra.gmra.mrb[92].mxu1 %vm1400_vm11, %v4525_v49  ;;  %v3223_v6 = vsel %vm1228_vm9, %v3217_v58, %v3219_v62  ;;  %v3222_v28 = vsel %vm1228_vm9, %v3215_v55, %v3217_v58 }
 0x2ce   : > { %4814 = vmatpush3.bf16.msra.mxu1 %v3017_v53  ;;  %4527 = vmatmul.mubr.msk.bf16.vlgmr.msra.gmra.mrb[92].mxu0 %vm1400_vm11, %v4525_v49  ;;  %v3229_v29 = vsel %vm1404_vm10, %v3222_v28, 0 }
 0x2cf   : > { %3020 = vmatpush1.bf16.msra.mxu0 %v3011_v54  ;;  %4815 = vmatprep.mubr.msk.bf16.mxu1 %vm4940_vm0, %v4939_v0 }
 0x2d0   : > { %4538 = vmatprep.subr.msk.bf16.mxu0 %vm1404_vm10, %v3114_v56  ;;  %4819 = vmatprep.subr.bf16.mxu1 %v4939_v0  ;;  %v3221_v7 = vpop.permute.xlu1 %3220 }
 0x2d1   : > { %3051 = vmatprep.mubr.bf16.mxu0 %v5422_v27  ;;  %v3224_v8 = vsel %vm1228_vm9, %v3219_v62, %v3221_v7 }
 0x2d2   : > { %v3235_v37 = vsel %vm1404_vm10, %v3224_v8, 0 }
 0x2d5   : > { %4816 = vmatmul.mubr.msk.bf16.vlgmr.msra.gmra.mrb[96].mxu1 %vm1400_vm11, %v4529_v60 }
 0x2d6   : > { %4820 = vmatpush3.bf16.msra.mxu1 %v3126_v63  ;;  %4535 = vmatmul.mubr.msk.bf16.vlgmr.msra.gmra.mrb[96].mxu0 %vm1400_vm11, %v4529_v60 }
 0x2d7   : > { %3129 = vmatpush1.bf16.msra.mxu0 %v3120_v5  ;;  %4821 = vmatprep.mubr.msk.bf16.mxu1 %vm4940_vm0, %v4939_v0 }
 0x2d8   : > { %4542 = vmatprep.subr.msk.bf16.mxu0 %vm1404_vm10, %v3223_v6  ;;  %4825 = vmatprep.subr.bf16.mxu1 %v4939_v0 }
 0x2d9   : > { %3160 = vmatprep.mubr.bf16.mxu0 %v5422_v27 }
 0x2dd   : > { %4822 = vmatmul.mubr.msk.bf16.vlgmr.msra.gmra.mrb[100].mxu1 %vm1400_vm11, %v4537_v9 }
 0x2de   : > { %4826 = vmatpush3.bf16.msra.mxu1 %v3235_v37  ;;  %4539 = vmatmul.mubr.msk.bf16.vlgmr.msra.gmra.mrb[100].mxu0 %vm1400_vm11, %v4537_v9 }
 0x2df   : > { %3238 = vmatpush1.bf16.msra.mxu0 %v3229_v29  ;;  %4827 = vmatprep.mubr.msk.bf16.mxu1 %vm4940_vm0, %v4939_v0 }
 0x2e0   : > { %3269 = vmatprep.mubr.bf16.mxu0 %v5422_v27  ;;  %4831 = vmatprep.subr.bf16.mxu1 %v4939_v0 }
 0x2e5   : > { %4828 = vmatmul.mubr.msk.bf16.vlgmr.msra.gmra.mrb[104].mxu1 %vm1400_vm11, %v4541_v10 }
 0x2e6   : > { %4543 = vmatmul.mubr.msk.bf16.vlgmr.msra.gmra.mrb[104].mxu0 %vm1400_vm11, %v4541_v10  ;;  %4833 = vmatprep.mubr.msk.bf16.mxu1 %vm4940_vm0, %v4939_v0 }
 0x2e7   : > { %3428 = vmatprep.mubr.bf16.mxu0 %v5422_v27 }
 0x2fc   : > { %v1685_v11 = vpop.f32.mrb[44].mxu1 }
 0x2fd   : > { %v1693_v12 = vadd.f32 %v1685_v11, %v5447_v47  ;;  %v4739_v13 = vpop.f32.mrb[45].mxu1 }
 0x2fe   : > { %v1644_v14 = vpop.f32.mrb[44].mxu0  ;;  %v1688_v3 = vpop.f32.mrb[46].mxu1 }
 0x2ff   : > { %v1691_v15 = vadd.f32 %v1644_v14, %v5443_v41  ;;  %v1646_v17 = vpop.f32.mrb[45].mxu0  ;;  %v4740_v18 = vpop.f32.mrb[47].mxu1 }
 0x300   : > { %v1692_v4 = vadd.f32 %v1646_v17, %v5445_v43  ;;  %v1648_v2 = vpop.f32.mrb[46].mxu0 }
 0x301   : > { %v1649_v19 = vpop.f32.mrb[47].mxu0 }
 0x304   : > { %v1791_v20 = vpop.f32.mrb[48].mxu1 }
 0x305   : > { %v1799_v21 = vadd.f32 %v1791_v20, %v1693_v12  ;;  %v4745_v22 = vpop.f32.mrb[49].mxu1 }
 0x306   : > { %v1750_v23 = vpop.f32.mrb[48].mxu0  ;;  %v1794_v24 = vpop.f32.mrb[50].mxu1 }
 0x307   : > { %v1797_v1 = vadd.f32 %v1750_v23, %v1691_v15  ;;  %v1752_v25 = vpop.f32.mrb[49].mxu0  ;;  %v4746_v26 = vpop.f32.mrb[51].mxu1 }
 0x308   : > { %v1798_v47 = vadd.f32 %v1752_v25, %v1692_v4  ;;  %v1754_v30 = vpop.f32.mrb[50].mxu0 }
 0x309   : > { %v1755_v31 = vpop.f32.mrb[51].mxu0 }
 0x30c   : > { %v1897_v32 = vpop.f32.mrb[52].mxu1 }
 0x30d   : > { %v1905_v33 = vadd.f32 %v1897_v32, %v1799_v21  ;;  %v4751_v41 = vpop.f32.mrb[53].mxu1 }
 0x30e   : > { %v1856_v34 = vpop.f32.mrb[52].mxu0  ;;  %v1900_v35 = vpop.f32.mrb[54].mxu1 }
 0x30f   : > { %v1903_v36 = vadd.f32 %v1856_v34, %v1797_v1  ;;  %v1858_v43 = vpop.f32.mrb[53].mxu0  ;;  %v4752_v38 = vpop.f32.mrb[55].mxu1 }
 0x310   : > { %v1904_v39 = vadd.f32 %v1858_v43, %v1798_v47  ;;  %v1860_v40 = vpop.f32.mrb[54].mxu0 }
 0x311   : > { %v1861_v42 = vpop.f32.mrb[55].mxu0 }
 0x314   : > { %v2003_v44 = vpop.f32.mrb[56].mxu1 }
 0x315   : > { %v2011_v45 = vadd.f32 %v2003_v44, %v1905_v33  ;;  %v4757_v46 = vpop.f32.mrb[57].mxu1 }
 0x316   : > { %v1962_v49 = vpop.f32.mrb[56].mxu0  ;;  %v2006_v50 = vpop.f32.mrb[58].mxu1 }
 0x317   : > { %v2009_v51 = vadd.f32 %v1962_v49, %v1903_v36  ;;  %v1964_v53 = vpop.f32.mrb[57].mxu0  ;;  %v4758_v54 = vpop.f32.mrb[59].mxu1 }
 0x318   : > { %v2010_v55 = vadd.f32 %v1964_v53, %v1904_v39  ;;  %v1966_v56 = vpop.f32.mrb[58].mxu0 }
 0x319   : > { %v1967_v58 = vpop.f32.mrb[59].mxu0 }
 0x31c   : > { %v2124_v59 = vpop.f32.mrb[60].mxu1 }
 0x31d   : > { %v2132_v60 = vadd.f32 %v2124_v59, %v2011_v45  ;;  %v4763_v61 = vpop.f32.mrb[61].mxu1 }
 0x31e   : > { %v2083_v62 = vpop.f32.mrb[60].mxu0  ;;  %v2127_v63 = vpop.f32.mrb[62].mxu1 }
 0x31f   : > { %v2130_v5 = vadd.f32 %v2083_v62, %v2009_v51  ;;  %v2085_v6 = vpop.f32.mrb[61].mxu0  ;;  %v4764_v7 = vpop.f32.mrb[63].mxu1 }
 0x320   : > { %v2131_v8 = vadd.f32 %v2085_v6, %v2010_v55  ;;  %v2087_v9 = vpop.f32.mrb[62].mxu0 }
 0x321   : > { %v2088_v28 = vpop.f32.mrb[63].mxu0 }
 0x324   : > { %v2233_v37 = vpop.f32.mrb[64].mxu1 }
 0x325   : > { %v2241_v29 = vadd.f32 %v2233_v37, %v2132_v60  ;;  %v4769_v10 = vpop.f32.mrb[65].mxu1 }
 0x326   : > { %v2192_v11 = vpop.f32.mrb[64].mxu0  ;;  %v2236_v12 = vpop.f32.mrb[66].mxu1 }
 0x327   : > { %v2239_v13 = vadd.f32 %v2192_v11, %v2130_v5  ;;  %v2194_v14 = vpop.f32.mrb[65].mxu0  ;;  %v4770_v3 = vpop.f32.mrb[67].mxu1 }
 0x328   : > { %v2240_v15 = vadd.f32 %v2194_v14, %v2131_v8  ;;  %v2196_v17 = vpop.f32.mrb[66].mxu0 }
 0x329   : > { %v2197_v18 = vpop.f32.mrb[67].mxu0 }
 0x32c   : > { %v2342_v4 = vpop.f32.mrb[68].mxu1 }
 0x32d   : > { %v5585_v2 = vadd.f32 %v2342_v4, %v2241_v29  ;;  %v4775_v19 = vpop.f32.mrb[69].mxu1 }
 0x32e   : > { %v2301_v20 = vpop.f32.mrb[68].mxu0  ;;  %v2345_v21 = vpop.f32.mrb[70].mxu1 }
 0x32f   : > { %v5587_v22 = vadd.f32 %v2301_v20, %v2239_v13  ;;  %v2303_v23 = vpop.f32.mrb[69].mxu0  ;;  %v4776_v24 = vpop.f32.mrb[71].mxu1 }
 0x330   : > { %v5589_v1 = vadd.f32 %v2303_v23, %v2240_v15  ;;  %v2305_v25 = vpop.f32.mrb[70].mxu0 }
 0x331   : > { %v2306_v26 = vpop.f32.mrb[71].mxu0 }
 0x378   : > { %v2459_v47 = vpop.f32.mrb[72].mxu1 }
 0x379   : > { %v2418_v30 = vpop.f32.mrb[72].mxu0  ;;  %v4781_v31 = vpop.f32.mrb[73].mxu1 }
 0x37a   : > { %v2420_v32 = vpop.f32.mrb[73].mxu0  ;;  %v2462_v33 = vpop.f32.mrb[74].mxu1 }
 0x37b   : > { %v2422_v41 = vpop.f32.mrb[74].mxu0  ;;  %v4782_v34 = vpop.f32.mrb[75].mxu1 }
 0x37c   : > { %v2423_v35 = vpop.f32.mrb[75].mxu0 }
 0x380   : > { %v2552_v36 = vpop.f32.mrb[76].mxu1 }
 0x381   : > { %v2553_v43 = vadd.f32 %v2552_v36, %v2459_v47  ;;  %v2511_v38 = vpop.f32.mrb[76].mxu0  ;;  %v4787_v39 = vpop.f32.mrb[77].mxu1 }
 0x382   : > { %v2512_v40 = vadd.f32 %v2511_v38, %v2418_v30  ;;  %v2513_v42 = vpop.f32.mrb[77].mxu0  ;;  %v2555_v44 = vpop.f32.mrb[78].mxu1 }
 0x383   : > { %v2514_v45 = vadd.f32 %v2513_v42, %v2420_v32  ;;  %v2515_v46 = vpop.f32.mrb[78].mxu0  ;;  %v4788_v49 = vpop.f32.mrb[79].mxu1 }
 0x384   : > { %v2516_v50 = vpop.f32.mrb[79].mxu0 }
 0x388   : > { %v2655_v51 = vpop.f32.mrb[80].mxu1 }
 0x389   : > { %v2663_v53 = vadd.f32 %v2655_v51, %v2553_v43  ;;  %v2614_v54 = vpop.f32.mrb[80].mxu0  ;;  %v4793_v55 = vpop.f32.mrb[81].mxu1 }
 0x38a   : > { %v2661_v56 = vadd.f32 %v2614_v54, %v2512_v40  ;;  %v2616_v58 = vpop.f32.mrb[81].mxu0  ;;  %v2658_v59 = vpop.f32.mrb[82].mxu1 }
 0x38b   : > { %v2662_v60 = vadd.f32 %v2616_v58, %v2514_v45  ;;  %v2618_v61 = vpop.f32.mrb[82].mxu0  ;;  %v4794_v62 = vpop.f32.mrb[83].mxu1 }
 0x38c   : > { %v2619_v63 = vpop.f32.mrb[83].mxu0 }
 0x390   : > { %v2761_v5 = vpop.f32.mrb[84].mxu1 }
 0x391   : > { %v2769_v6 = vadd.f32 %v2761_v5, %v2663_v53  ;;  %v2720_v7 = vpop.f32.mrb[84].mxu0  ;;  %v4799_v8 = vpop.f32.mrb[85].mxu1 }
 0x392   : > { %v2767_v9 = vadd.f32 %v2720_v7, %v2661_v56  ;;  %v2722_v28 = vpop.f32.mrb[85].mxu0  ;;  %v2764_v37 = vpop.f32.mrb[86].mxu1 }
 0x393   : > { %v2768_v29 = vadd.f32 %v2722_v28, %v2662_v60  ;;  %v2724_v10 = vpop.f32.mrb[86].mxu0  ;;  %v4800_v11 = vpop.f32.mrb[87].mxu1 }
 0x394   : > { %v2725_v12 = vpop.f32.mrb[87].mxu0 }
 0x398   : > { %v2867_v13 = vpop.f32.mrb[88].mxu1 }
 0x399   : > { %v2875_v14 = vadd.f32 %v2867_v13, %v2769_v6  ;;  %v2826_v3 = vpop.f32.mrb[88].mxu0  ;;  %v4805_v15 = vpop.f32.mrb[89].mxu1 }
 0x39a   : > { %v2873_v17 = vadd.f32 %v2826_v3, %v2767_v9  ;;  %v2828_v18 = vpop.f32.mrb[89].mxu0  ;;  %v2870_v4 = vpop.f32.mrb[90].mxu1 }
 0x39b   : > { %v2874_v19 = vadd.f32 %v2828_v18, %v2768_v29  ;;  %v2830_v20 = vpop.f32.mrb[90].mxu0  ;;  %v4806_v21 = vpop.f32.mrb[91].mxu1 }
 0x39c   : > { %v2831_v23 = vpop.f32.mrb[91].mxu0  ;;  %v3328_v6 = vpop.permute.xlu0 %3327 }
 0x3a0   : > { %v2973_v24 = vpop.f32.mrb[92].mxu1 }
 0x3a1   : > { %v2981_v25 = vadd.f32 %v2973_v24, %v2875_v14  ;;  %v2932_v26 = vpop.f32.mrb[92].mxu0  ;;  %v4811_v47 = vpop.f32.mrb[93].mxu1 }
 0x3a2   : > { %v2979_v30 = vadd.f32 %v2932_v26, %v2873_v17  ;;  %v2934_v31 = vpop.f32.mrb[93].mxu0  ;;  %v2976_v32 = vpop.f32.mrb[94].mxu1 }
 0x3a3   : > { %v2980_v33 = vadd.f32 %v2934_v31, %v2874_v19  ;;  %v2936_v41 = vpop.f32.mrb[94].mxu0  ;;  %v4812_v34 = vpop.f32.mrb[95].mxu1 }
 0x3a4   : > { %v2937_v35 = vpop.f32.mrb[95].mxu0  ;;  %v4333_v34 = vld [vmem:[%s5772_s8] sm:$0xff] }
 0x3a8   : > { %v3094_v36 = vpop.f32.mrb[96].mxu1 }
 0x3a9   : > { %v3102_v43 = vadd.f32 %v3094_v36, %v2981_v25  ;;  %v3053_v38 = vpop.f32.mrb[96].mxu0  ;;  %v4817_v39 = vpop.f32.mrb[97].mxu1 }
 0x3aa   : > { %v3100_v40 = vadd.f32 %v3053_v38, %v2979_v30  ;;  %v3055_v42 = vpop.f32.mrb[97].mxu0  ;;  %v3097_v44 = vpop.f32.mrb[98].mxu1 }
 0x3ab   : > { %v3101_v45 = vadd.f32 %v3055_v42, %v2980_v33  ;;  %v3057_v46 = vpop.f32.mrb[98].mxu0  ;;  %v4818_v49 = vpop.f32.mrb[99].mxu1 }
 0x3ac   : > { %v3058_v50 = vpop.f32.mrb[99].mxu0 }
 0x3b0   : > { %v3203_v51 = vpop.f32.mrb[100].mxu1 }
 0x3b1   : > { %v3211_v53 = vadd.f32 %v3203_v51, %v3102_v43  ;;  %v3162_v54 = vpop.f32.mrb[100].mxu0  ;;  %v4823_v55 = vpop.f32.mrb[101].mxu1 }
 0x3b2   : > { %v3209_v56 = vadd.f32 %v3162_v54, %v3100_v40  ;;  %v3164_v58 = vpop.f32.mrb[101].mxu0  ;;  %v3206_v59 = vpop.f32.mrb[102].mxu1 }
 0x3b3   : > { %v3210_v60 = vadd.f32 %v3164_v58, %v3101_v45  ;;  %v3166_v61 = vpop.f32.mrb[102].mxu0  ;;  %v4824_v62 = vpop.f32.mrb[103].mxu1  ;;  %v4547_v45 = vld [vmem:[%s5771_s7 + $0x4] sm:$0xf] }
 0x3b4   : > { %v3167_v63 = vpop.f32.mrb[103].mxu0 }
 0x3b8   : > { %v3312_v5 = vpop.f32.mrb[104].mxu1 }
 0x3b9   : > { %v3320_v7 = vadd.f32 %v3312_v5, %v3211_v53  ;;  %v3271_v8 = vpop.f32.mrb[104].mxu0  ;;  %v4829_v9 = vpop.f32.mrb[105].mxu1 }
 0x3ba   : > { %v3318_v28 = vadd.f32 %v3271_v8, %v3209_v56  ;;  %v3273_v37 = vpop.f32.mrb[105].mxu0  ;;  %v3315_v29 = vpop.f32.mrb[106].mxu1  ;;  %v3363_v56 = vld [vmem:[%s5771_s7] sm:$0xf] }
 0x3bb   : > { %v3323_v10 = vadd.f32 %v3320_v7, %v5585_v2  ;;  %v3319_v11 = vadd.f32 %v3273_v37, %v3210_v60  ;;  %v3275_v12 = vpop.f32.mrb[106].mxu0  ;;  %v4830_v13 = vpop.f32.mrb[107].mxu1  ;;  %v4557_v7 = vld [vmem:[%s5771_s7 + $0x8] sm:$0xf] }
 0x3bc   : > { %v3321_v14 = vadd.f32 %v3318_v28, %v5587_v22  ;;  %v3276_v3 = vpop.f32.mrb[107].mxu0  ;;  %v4561_v13 = vld [vmem:[%s5771_s7 + $0xc] sm:$0xf] }
 0x3bd   : > { %v3322_v15 = vadd.f32 %v3319_v11, %v5589_v1  ;;  %v3332_v17 = vadd.f32 %v3328_v6, %v3323_v10 }
 0x3be   : > { %v3330_v18 = vadd.f32 %v3328_v6, %v3321_v14 }
 0x3bf   : > { %v3331_v4 = vadd.f32 %v3328_v6, %v3322_v15  ;;  %v3335_v21 = vmax.f32 %v3332_v17, 0.0 }
 0x3c0   : > { %v3333_v19 = vmax.f32 %v3330_v18, 0.0 }
 0x3c1   : > { %v3334_v20 = vmax.f32 %v3331_v4, 0.0  ;;  %v3338_v2 = vmul.f32 %v3335_v21, %v5202_v48  ;;  %v4565_v21 = vld [vmem:[%s5771_s7 + $0x10] sm:$0xf] }
 0x3c2   : > { %v3336_v23 = vmul.f32 %v3333_v19, %v5204_v52 }
 0x3c3   : > { %v3337_v24 = vmul.f32 %v3334_v20, %v5206_v57  ;;  %v4596_v26 = vpack.c.bf16 %v3338_v2, %v3338_v2 }
 0x3c5   : > { %v4595_v25 = vpack.c.bf16 %v3337_v24, %v3336_v23 }
 0x3c7   : > { %3352 = vrot.lane.b32.xlu1 %v4595_v25, %s4950_s15 }
 0x3cb   : > { %3354 = vrot.lane.b32.xlu1 %v4596_v26, %s4950_s15 }
 0x439   : > { %v3353_v22 = vpop.permute.xlu1 %3352 }
 0x43a   : > { %v3356_v1 = vrot.slane %v3353_v22, 4 }
 0x43c   : > { %v3357_v47 = vsel %vm1368_vm14, %v3356_v1, %v3353_v22 }
 0x43d   : > { %3361 = vst.msk [vmem:[#allocation3] sm:$0xff] %vm5277_vm15, %v3357_v47  ;;  %v3355_v30 = vpop.permute.xlu1 %3354  ;;  %v4569_v47 = vld [vmem:[%s5771_s7 + $0x14] sm:$0xf] }
 0x43e   : > { %v3358_v52 = vsel %vm1368_vm14, %v3356_v1, %v3355_v30 }
 0x43f   : > { %3362 = vst.msk [vmem:[#allocation3 + $0x8] sm:$0xf] %vm1377_vm2, %v3358_v52 }
 0x444   : > { %v3364_v57 = vld [vmem:[#allocation3] sm:$0xff] }
 0x445   : > { %v4549_v31 = vcombine.high %v3364_v57, %v3364_v57  ;;  %v4548_v48 = vcombine.low %v3364_v57, %v3364_v57 }
 0x446   : > { %v4927_v32 = vld [vmem:[#allocation3 + $0x8] ss:$0 sps:$4 sm:$0xff]  }
 0x447   : > { %3378 = vrot.lane.b32.xlu1 %v4549_v31, %s4942_s19  ;;  %3376 = vrot.lane.b32.xlu0 %v4548_v48, %s4942_s19  ;;  %v3997_v16 = vld [vmem:[#allocation3 + $0x8] sm:$0xff]  ;;  %v3487_v50 = vsel %vm1404_vm10, %v4927_v32, 0  ;;  %v3481_v51 = vsel %vm1404_vm10, %v4548_v48, 0 }
 0x448   : > { %v4576_v33 = vcombine.low %v3997_v16, %v3997_v16  ;;  %v4577_v41 = vcombine.high %v3997_v16, %v3997_v16 }
 0x44b   : > { %3572 = vrot.lane.b32.xlu1 %v4548_v48, %s4943_s20  ;;  %3380 = vrot.lane.b32.xlu0 %v4927_v32, %s4942_s19 }
 0x44f   : > { %3576 = vrot.lane.b32.xlu1 %v4927_v32, %s4943_s20  ;;  %3574 = vrot.lane.b32.xlu0 %v4549_v31, %s4943_s20 }
 0x453   : > { %3680 = vrot.lane.b32.xlu1 %v4549_v31, %s4944_s21  ;;  %3678 = vrot.lane.b32.xlu0 %v4548_v48, %s4944_s21 }
 0x457   : > { %3784 = vrot.lane.b32.xlu1 %v4548_v48, %s4945_s22  ;;  %3682 = vrot.lane.b32.xlu0 %v4927_v32, %s4944_s21  ;;  %s4885_s21 = smul.u32 24, %s5778_s14 }
 0x45b   : > { %3788 = vrot.lane.b32.xlu1 %v4927_v32, %s4945_s22  ;;  %3786 = vrot.lane.b32.xlu0 %v4549_v31, %s4945_s22 }
 0x45f   : > { %3892 = vrot.lane.b32.xlu1 %v4549_v31, %s4946_s23  ;;  %3890 = vrot.lane.b32.xlu0 %v4548_v48, %s4946_s23 }
 0x463   : > { %4008 = vrot.lane.b32.xlu1 %v4548_v48, %s4947_s24  ;;  %3894 = vrot.lane.b32.xlu0 %v4927_v32, %s4946_s23 }
 0x467   : > { %4012 = vrot.lane.b32.xlu1 %v4576_v33, %s4947_s24  ;;  %4010 = vrot.lane.b32.xlu0 %v4549_v31, %s4947_s24 }
 0x46b   : > { %4117 = vrot.lane.b32.xlu1 %v4548_v48, %s4948_s25  ;;  %4014 = vrot.lane.b32.xlu0 %v4577_v41, %s4947_s24  ;;  %s379_s24 = scalar_lea.vmem %s5774_s10, %s4885_s21 }
 0x46f   : > { %4121 = vrot.lane.b32.xlu1 %v4576_v33, %s4948_s25  ;;  %4119 = vrot.lane.b32.xlu0 %v4549_v31, %s4948_s25 }
 0x473   : > { %4226 = vrot.lane.b32.xlu1 %v4548_v48, %s4949_s26  ;;  %4123 = vrot.lane.b32.xlu0 %v4577_v41, %s4948_s25 }
 0x477   : > { %4230 = vrot.lane.b32.xlu1 %v4576_v33, %s4949_s26  ;;  %4228 = vrot.lane.b32.xlu0 %v4549_v31, %s4949_s26 }
 0x47b   : > { %4336 = vperm.xlu1 %4906, %v4333_v34   ;;  %4232 = vrot.lane.b32.xlu0 %v4577_v41, %s4949_s26  ;;  %v4573_v41 = vld [vmem:[%s5771_s7 + $0x18] sm:$0xf] }
 0x4b9   : > { %v3377_v35 = vpop.permute.xlu0 %3376  ;;  %v3379_v36 = vpop.permute.xlu1 %3378 }
 0x4ba   : > { %v3382_v43 = vsel %vm408_vm1, %v3377_v35, %v3379_v36 }
 0x4bb   : > { %v3388_v44 = vsel %vm1404_vm10, %v3382_v43, 0 }
 0x4bd   : > { %v3381_v38 = vpop.permute.xlu0 %3380  ;;  %v3573_v39 = vpop.permute.xlu1 %3572 }
 0x4be   : > { %v3383_v40 = vsel %vm408_vm1, %v3379_v36, %v3381_v38  ;;  %v3394_v42 = vsel %vm1404_vm10, %v3381_v38, 0 }
 0x4bf   : > { %4551 = vmatprep.subr.msk.bf16.mxu0 %vm1404_vm10, %v3383_v40  ;;  %4832 = vmatpush3.bf16.msra.mxu1 %v3394_v42  ;;  %v4581_v42 = vld [vmem:[%s5771_s7 + $0x1c] sm:$0xf] }
 0x4c0   : > { %3397 = vmatpush1.bf16.msra.mxu0 %v3388_v44  ;;  %4837 = vmatprep.subr.bf16.mxu1 %v4939_v0 }
 0x4c1   : > { %v3575_v46 = vpop.permute.xlu0 %3574  ;;  %4554 = vmatprep.subr.msk.bf16.mxu0 %vm1404_vm10, %v4549_v31  ;;  %v3577_v49 = vpop.permute.xlu1 %3576 }
 0x4c2   : > { %4834 = vmatmul.mubr.msk.bf16.vlgmr.msra.gmra.mrb[108].mxu1 %vm1400_vm11, %v4547_v45  ;;  %v3579_v53 = vsel %vm594_vm3, %v3575_v46, %v3577_v49  ;;  %v3578_v58 = vsel %vm594_vm3, %v3573_v39, %v3575_v46  ;;  %v3590_v61 = vsel %vm1404_vm10, %v3577_v49, 0  ;;  %v4585_v49 = vld [vmem:[%s5771_s7 + $0x20] sm:$0xf] }
 0x4c3   : > { %4552 = vmatmul.mubr.msk.bf16.vlgmr.msra.gmra.mrb[108].mxu0 %vm1400_vm11, %v4547_v45  ;;  %4838 = vmatpush3.bf16.msra.mxu1 %v3487_v50  ;;  %v3584_v63 = vsel %vm1404_vm10, %v3578_v58, 0 }
 0x4c4   : > { %3490 = vmatpush1.bf16.msra.mxu0 %v3481_v51  ;;  %4839 = vmatprep.mubr.msk.bf16.mxu1 %vm4940_vm0, %v4939_v0 }
 0x4c5   : > { %v3679_v54 = vpop.permute.xlu0 %3678  ;;  %4558 = vmatprep.subr.msk.bf16.mxu0 %vm1404_vm10, %v3579_v53  ;;  %v3681_v55 = vpop.permute.xlu1 %3680  ;;  %4843 = vmatprep.subr.bf16.mxu1 %v4939_v0 }
 0x4c6   : > { %3521 = vmatprep.mubr.bf16.mxu0 %v5422_v27  ;;  %v3684_v8 = vsel %vm695_vm4, %v3679_v54, %v3681_v55 }
 0x4c7   : > { %v3690_v29 = vsel %vm1404_vm10, %v3684_v8, 0 }
 0x4c9   : > { %v3683_v59 = vpop.permute.xlu0 %3682  ;;  %v3785_v60 = vpop.permute.xlu1 %3784 }
 0x4ca   : > { %v3685_v62 = vsel %vm695_vm4, %v3681_v55, %v3683_v59  ;;  %4840 = vmatmul.mubr.msk.bf16.vlgmr.msra.gmra.mrb[112].mxu1 %vm1400_vm11, %v3363_v56  ;;  %v3696_v37 = vsel %vm1404_vm10, %v3683_v59, 0 }
 0x4cb   : > { %4844 = vmatpush3.bf16.msra.mxu1 %v3590_v61  ;;  %4555 = vmatmul.mubr.msk.bf16.vlgmr.msra.gmra.mrb[112].mxu0 %vm1400_vm11, %v3363_v56 }
 0x4cc   : > { %3593 = vmatpush1.bf16.msra.mxu0 %v3584_v63  ;;  %4845 = vmatprep.mubr.msk.bf16.mxu1 %vm4940_vm0, %v4939_v0 }
 0x4cd   : > { %4562 = vmatprep.subr.msk.bf16.mxu0 %vm1404_vm10, %v3685_v62  ;;  %v3787_v5 = vpop.permute.xlu0 %3786  ;;  %v3789_v6 = vpop.permute.xlu1 %3788  ;;  %4849 = vmatprep.subr.bf16.mxu1 %v4939_v0 }
 0x4ce   : > { %3624 = vmatprep.mubr.bf16.mxu0 %v5422_v27  ;;  %v3791_v10 = vsel %vm796_vm5, %v3787_v5, %v3789_v6  ;;  %v3790_v14 = vsel %vm796_vm5, %v3785_v60, %v3787_v5  ;;  %v3802_v17 = vsel %vm1404_vm10, %v3789_v6, 0 }
 0x4cf   : > { %v3796_v18 = vsel %vm1404_vm10, %v3790_v14, 0 }
 0x4d1   : > { %v3891_v9 = vpop.permute.xlu0 %3890  ;;  %v3893_v28 = vpop.permute.xlu1 %3892 }
 0x4d2   : > { %4846 = vmatmul.mubr.msk.bf16.vlgmr.msra.gmra.mrb[116].mxu1 %vm1400_vm11, %v4557_v7  ;;  %v3896_v23 = vsel %vm897_vm6, %v3891_v9, %v3893_v28 }
 0x4d3   : > { %4850 = vmatpush3.bf16.msra.mxu1 %v3696_v37  ;;  %4559 = vmatmul.mubr.msk.bf16.vlgmr.msra.gmra.mrb[116].mxu0 %vm1400_vm11, %v4557_v7  ;;  %v3902_v2 = vsel %vm1404_vm10, %v3896_v23, 0 }
 0x4d4   : > { %3699 = vmatpush1.bf16.msra.mxu0 %v3690_v29  ;;  %4851 = vmatprep.mubr.msk.bf16.mxu1 %vm4940_vm0, %v4939_v0 }
 0x4d5   : > { %4566 = vmatprep.subr.msk.bf16.mxu0 %vm1404_vm10, %v3791_v10  ;;  %v3895_v11 = vpop.permute.xlu0 %3894  ;;  %v4009_v12 = vpop.permute.xlu1 %4008  ;;  %4855 = vmatprep.subr.bf16.mxu1 %v4939_v0 }
 0x4d6   : > { %3730 = vmatprep.mubr.bf16.mxu0 %v5422_v27  ;;  %v3897_v4 = vsel %vm897_vm6, %v3893_v28, %v3895_v11  ;;  %v3908_v24 = vsel %vm1404_vm10, %v3895_v11, 0 }
 0x4d9   : > { %v4011_v3 = vpop.permute.xlu0 %4010  ;;  %v4013_v15 = vpop.permute.xlu1 %4012 }
 0x4da   : > { %4852 = vmatmul.mubr.msk.bf16.vlgmr.msra.gmra.mrb[120].mxu1 %vm1400_vm11, %v4561_v13  ;;  %v4017_v26 = vsel %vm1020_vm7, %v4011_v3, %v4013_v15  ;;  %v4016_v30 = vsel %vm1020_vm7, %v4009_v12, %v4011_v3 }
 0x4db   : > { %4856 = vmatpush3.bf16.msra.mxu1 %v3802_v17  ;;  %4563 = vmatmul.mubr.msk.bf16.vlgmr.msra.gmra.mrb[120].mxu0 %vm1400_vm11, %v4561_v13  ;;  %v4023_v31 = vsel %vm1404_vm10, %v4016_v30, 0 }
 0x4dc   : > { %3805 = vmatpush1.bf16.msra.mxu0 %v3796_v18  ;;  %4857 = vmatprep.mubr.msk.bf16.mxu1 %vm4940_vm0, %v4939_v0 }
 0x4dd   : > { %4570 = vmatprep.subr.msk.bf16.mxu0 %vm1404_vm10, %v3897_v4  ;;  %v4015_v19 = vpop.permute.xlu0 %4014  ;;  %4861 = vmatprep.subr.bf16.mxu1 %v4939_v0  ;;  %v4118_v20 = vpop.permute.xlu1 %4117 }
 0x4de   : > { %3836 = vmatprep.mubr.bf16.mxu0 %v5422_v27  ;;  %v4018_v1 = vsel %vm1020_vm7, %v4013_v15, %v4015_v19 }
 0x4df   : > { %v4029_v57 = vsel %vm1404_vm10, %v4018_v1, 0 }
 0x4e1   : > { %v4120_v25 = vpop.permute.xlu0 %4119  ;;  %v4122_v22 = vpop.permute.xlu1 %4121 }
 0x4e2   : > { %4858 = vmatmul.mubr.msk.bf16.vlgmr.msra.gmra.mrb[124].mxu1 %vm1400_vm11, %v4565_v21  ;;  %v4126_v32 = vsel %vm1124_vm8, %v4120_v25, %v4122_v22  ;;  %v4125_v34 = vsel %vm1124_vm8, %v4118_v20, %v4120_v25 }
 0x4e3   : > { %4862 = vmatpush3.bf16.msra.mxu1 %v3908_v24  ;;  %4567 = vmatmul.mubr.msk.bf16.vlgmr.msra.gmra.mrb[124].mxu0 %vm1400_vm11, %v4565_v21  ;;  %v4132_v43 = vsel %vm1404_vm10, %v4125_v34, 0 }
 0x4e4   : > { %3911 = vmatpush1.bf16.msra.mxu0 %v3902_v2  ;;  %4863 = vmatprep.mubr.msk.bf16.mxu1 %vm4940_vm0, %v4939_v0 }
 0x4e5   : > { %4578 = vmatprep.subr.msk.bf16.mxu0 %vm1404_vm10, %v4017_v26  ;;  %4867 = vmatprep.subr.bf16.mxu1 %v4939_v0  ;;  %v4124_v52 = vpop.permute.xlu0 %4123  ;;  %v4227_v48 = vpop.permute.xlu1 %4226 }
 0x4e6   : > { %3942 = vmatprep.mubr.bf16.mxu0 %v5422_v27  ;;  %v4127_v33 = vsel %vm1124_vm8, %v4122_v22, %v4124_v52 }
 0x4e7   : > { %v4138_v36 = vsel %vm1404_vm10, %v4127_v33, 0 }
 0x4e9   : > { %v4229_v16 = vpop.permute.xlu0 %4228  ;;  %v4231_v35 = vpop.permute.xlu1 %4230 }
 0x4ea   : > { %4864 = vmatmul.mubr.msk.bf16.vlgmr.msra.gmra.mrb[128].mxu1 %vm1400_vm11, %v4569_v47  ;;  %v4235_v38 = vsel %vm1228_vm9, %v4229_v16, %v4231_v35  ;;  %v4234_v44 = vsel %vm1228_vm9, %v4227_v48, %v4229_v16 }
 0x4eb   : > { %4868 = vmatpush3.bf16.msra.mxu1 %v4029_v57  ;;  %4571 = vmatmul.mubr.msk.bf16.vlgmr.msra.gmra.mrb[128].mxu0 %vm1400_vm11, %v4569_v47  ;;  %v4241_v46 = vsel %vm1404_vm10, %v4234_v44, 0 }
 0x4ec   : > { %4032 = vmatpush1.bf16.msra.mxu0 %v4023_v31  ;;  %4869 = vmatprep.mubr.msk.bf16.mxu1 %vm4940_vm0, %v4939_v0 }
 0x4ed   : > { %4582 = vmatprep.subr.msk.bf16.mxu0 %vm1404_vm10, %v4126_v32  ;;  %4873 = vmatprep.subr.bf16.mxu1 %v4939_v0  ;;  %v4233_v39 = vpop.permute.xlu0 %4232 }
 0x4ee   : > { %4063 = vmatprep.mubr.bf16.mxu0 %v5422_v27  ;;  %v4236_v40 = vsel %vm1228_vm9, %v4231_v35, %v4233_v39 }
 0x4ef   : > { %v4247_v45 = vsel %vm1404_vm10, %v4236_v40, 0 }
 0x4f2   : > { %4870 = vmatmul.mubr.msk.bf16.vlgmr.msra.gmra.mrb[132].mxu1 %vm1400_vm11, %v4573_v41 }
 0x4f3   : > { %4874 = vmatpush3.bf16.msra.mxu1 %v4138_v36  ;;  %4579 = vmatmul.mubr.msk.bf16.vlgmr.msra.gmra.mrb[132].mxu0 %vm1400_vm11, %v4573_v41 }
 0x4f4   : > { %4141 = vmatpush1.bf16.msra.mxu0 %v4132_v43  ;;  %4875 = vmatprep.mubr.msk.bf16.mxu1 %vm4940_vm0, %v4939_v0 }
 0x4f5   : > { %4586 = vmatprep.subr.msk.bf16.mxu0 %vm1404_vm10, %v4235_v38  ;;  %4879 = vmatprep.subr.bf16.mxu1 %v4939_v0 }
 0x4f6   : > { %4172 = vmatprep.mubr.bf16.mxu0 %v5422_v27 }
 0x4fa   : > { %4876 = vmatmul.mubr.msk.bf16.vlgmr.msra.gmra.mrb[136].mxu1 %vm1400_vm11, %v4581_v42 }
 0x4fb   : > { %4880 = vmatpush3.bf16.msra.mxu1 %v4247_v45  ;;  %4583 = vmatmul.mubr.msk.bf16.vlgmr.msra.gmra.mrb[136].mxu0 %vm1400_vm11, %v4581_v42 }
 0x4fc   : > { %4250 = vmatpush1.bf16.msra.mxu0 %v4241_v46  ;;  %4881 = vmatprep.mubr.msk.bf16.mxu1 %vm4940_vm0, %v4939_v0  ;;  %vm4347_vm0 = vcmask 850944  }
 0x4fd   : > { %4281 = vmatprep.mubr.bf16.mxu0 %v5422_v27 }
 0x502   : > { %4882 = vmatmul.mubr.msk.bf16.vlgmr.msra.gmra.mrb[140].mxu1 %vm1400_vm11, %v4585_v49 }
 0x503   : > { %4587 = vmatmul.mubr.msk.bf16.vlgmr.msra.gmra.mrb[140].mxu0 %vm1400_vm11, %v4585_v49 }
 0x595   : > { %v3471_v50 = vpop.f32.mrb[108].mxu1 }
 0x596   : > { %v3430_v51 = vpop.f32.mrb[108].mxu0  ;;  %v4835_v53 = vpop.f32.mrb[109].mxu1 }
 0x597   : > { %v3432_v54 = vpop.f32.mrb[109].mxu0  ;;  %v3474_v55 = vpop.f32.mrb[110].mxu1 }
 0x598   : > { %v3434_v56 = vpop.f32.mrb[110].mxu0  ;;  %v4836_v58 = vpop.f32.mrb[111].mxu1 }
 0x599   : > { %v3435_v59 = vpop.f32.mrb[111].mxu0 }
 0x59d   : > { %v3564_v60 = vpop.f32.mrb[112].mxu1 }
 0x59e   : > { %v3565_v0 = vadd.f32 %v3564_v60, %v3471_v50  ;;  %v3523_v61 = vpop.f32.mrb[112].mxu0  ;;  %v4841_v27 = vpop.f32.mrb[113].mxu1 }
 0x59f   : > { %v3524_v62 = vadd.f32 %v3523_v61, %v3430_v51  ;;  %v3525_v63 = vpop.f32.mrb[113].mxu0  ;;  %v3567_v5 = vpop.f32.mrb[114].mxu1 }
 0x5a0   : > { %v3526_v6 = vadd.f32 %v3525_v63, %v3432_v54  ;;  %v3527_v7 = vpop.f32.mrb[114].mxu0  ;;  %v4842_v8 = vpop.f32.mrb[115].mxu1 }
 0x5a1   : > { %v3528_v9 = vpop.f32.mrb[115].mxu0 }
 0x5a5   : > { %v3667_v28 = vpop.f32.mrb[116].mxu1 }
 0x5a6   : > { %v3675_v37 = vadd.f32 %v3667_v28, %v3565_v0  ;;  %v3626_v29 = vpop.f32.mrb[116].mxu0  ;;  %v4847_v10 = vpop.f32.mrb[117].mxu1 }
 0x5a7   : > { %v3673_v11 = vadd.f32 %v3626_v29, %v3524_v62  ;;  %v3628_v12 = vpop.f32.mrb[117].mxu0  ;;  %v3670_v13 = vpop.f32.mrb[118].mxu1 }
 0x5a8   : > { %v3674_v14 = vadd.f32 %v3628_v12, %v3526_v6  ;;  %v3630_v3 = vpop.f32.mrb[118].mxu0  ;;  %v4848_v15 = vpop.f32.mrb[119].mxu1 }
 0x5a9   : > { %v3631_v17 = vpop.f32.mrb[119].mxu0  ;;  %v4337_v29 = vpop.permute.xlu1 %4336 }
 0x5ad   : > { %v3773_v18 = vpop.f32.mrb[120].mxu1 }
 0x5ae   : > { %v3781_v4 = vadd.f32 %v3773_v18, %v3675_v37  ;;  %v3732_v19 = vpop.f32.mrb[120].mxu0  ;;  %v4853_v20 = vpop.f32.mrb[121].mxu1 }
 0x5af   : > { %v3779_v21 = vadd.f32 %v3732_v19, %v3673_v11  ;;  %v3734_v23 = vpop.f32.mrb[121].mxu0  ;;  %v3776_v24 = vpop.f32.mrb[122].mxu1 }
 0x5b0   : > { %v3780_v25 = vadd.f32 %v3734_v23, %v3674_v14  ;;  %v3736_v2 = vpop.f32.mrb[122].mxu0  ;;  %v4854_v26 = vpop.f32.mrb[123].mxu1 }
 0x5b1   : > { %v3737_v22 = vpop.f32.mrb[123].mxu0 }
 0x5b5   : > { %v3879_v1 = vpop.f32.mrb[124].mxu1 }
 0x5b6   : > { %v3887_v47 = vadd.f32 %v3879_v1, %v3781_v4  ;;  %v3838_v30 = vpop.f32.mrb[124].mxu0  ;;  %v4859_v52 = vpop.f32.mrb[125].mxu1 }
 0x5b7   : > { %v3885_v57 = vadd.f32 %v3838_v30, %v3779_v21  ;;  %v3840_v31 = vpop.f32.mrb[125].mxu0  ;;  %v3882_v48 = vpop.f32.mrb[126].mxu1 }
 0x5b8   : > { %v3886_v32 = vadd.f32 %v3840_v31, %v3780_v25  ;;  %v3842_v16 = vpop.f32.mrb[126].mxu0  ;;  %v4860_v33 = vpop.f32.mrb[127].mxu1 }
 0x5b9   : > { %v3843_v41 = vpop.f32.mrb[127].mxu0 }
 0x5bd   : > { %v3985_v34 = vpop.f32.mrb[128].mxu1 }
 0x5be   : > { %v3993_v35 = vadd.f32 %v3985_v34, %v3887_v47  ;;  %v3944_v36 = vpop.f32.mrb[128].mxu0  ;;  %v4865_v43 = vpop.f32.mrb[129].mxu1 }
 0x5bf   : > { %v3991_v38 = vadd.f32 %v3944_v36, %v3885_v57  ;;  %v3946_v39 = vpop.f32.mrb[129].mxu0  ;;  %v3988_v40 = vpop.f32.mrb[130].mxu1 }
 0x5c0   : > { %v3992_v42 = vadd.f32 %v3946_v39, %v3886_v32  ;;  %v3948_v44 = vpop.f32.mrb[130].mxu0  ;;  %v4866_v45 = vpop.f32.mrb[131].mxu1 }
 0x5c1   : > { %v3949_v46 = vpop.f32.mrb[131].mxu0 }
 0x5c5   : > { %v4106_v49 = vpop.f32.mrb[132].mxu1 }
 0x5c6   : > { %v4114_v50 = vadd.f32 %v4106_v49, %v3993_v35  ;;  %v4065_v51 = vpop.f32.mrb[132].mxu0  ;;  %v4871_v53 = vpop.f32.mrb[133].mxu1 }
 0x5c7   : > { %v4112_v54 = vadd.f32 %v4065_v51, %v3991_v38  ;;  %v4067_v55 = vpop.f32.mrb[133].mxu0  ;;  %v4109_v56 = vpop.f32.mrb[134].mxu1 }
 0x5c8   : > { %v4113_v58 = vadd.f32 %v4067_v55, %v3992_v42  ;;  %v4069_v59 = vpop.f32.mrb[134].mxu0  ;;  %v4872_v60 = vpop.f32.mrb[135].mxu1 }
 0x5c9   : > { %v4070_v0 = vpop.f32.mrb[135].mxu0 }
 0x5cd   : > { %v4215_v61 = vpop.f32.mrb[136].mxu1 }
 0x5ce   : > { %v4223_v27 = vadd.f32 %v4215_v61, %v4114_v50  ;;  %v4174_v62 = vpop.f32.mrb[136].mxu0  ;;  %v4877_v63 = vpop.f32.mrb[137].mxu1 }
 0x5cf   : > { %v4221_v5 = vadd.f32 %v4174_v62, %v4112_v54  ;;  %v4176_v6 = vpop.f32.mrb[137].mxu0  ;;  %v4218_v7 = vpop.f32.mrb[138].mxu1 }
 0x5d0   : > { %v4222_v8 = vadd.f32 %v4176_v6, %v4113_v58  ;;  %v4178_v9 = vpop.f32.mrb[138].mxu0  ;;  %v4878_v28 = vpop.f32.mrb[139].mxu1 }
 0x5d1   : > { %v4179_v37 = vpop.f32.mrb[139].mxu0 }
 0x5d5   : > { %v4324_v10 = vpop.f32.mrb[140].mxu1 }
 0x5d6   : > { %v4332_v11 = vadd.f32 %v4324_v10, %v4223_v27  ;;  %v4283_v12 = vpop.f32.mrb[140].mxu0  ;;  %v4883_v13 = vpop.f32.mrb[141].mxu1 }
 0x5d7   : > { %v4330_v14 = vadd.f32 %v4283_v12, %v4221_v5  ;;  %v4285_v3 = vpop.f32.mrb[141].mxu0  ;;  %v4327_v15 = vpop.f32.mrb[142].mxu1 }
 0x5d8   : > { %v4341_v17 = vadd.f32 %v4337_v29, %v4332_v11  ;;  %v4331_v18 = vadd.f32 %v4285_v3, %v4222_v8  ;;  %v4287_v4 = vpop.f32.mrb[142].mxu0  ;;  %v4884_v19 = vpop.f32.mrb[143].mxu1 }
 0x5d9   : > { %v4339_v20 = vadd.f32 %v4337_v29, %v4330_v14  ;;  %v4288_v21 = vpop.f32.mrb[143].mxu0 }
 0x5da   : > { %v4344_v23 = vmax.f32 %v4341_v17, 0.0  ;;  %v4340_v24 = vadd.f32 %v4337_v29, %v4331_v18 }
 0x5db   : > { %v4342_v25 = vmax.f32 %v4339_v20, 0.0 }
 0x5dc   : > { %4348 = vst.msk [vmem:[%s379_s24 + $0x10] sm:$0xff] %vm4347_vm0, %v4344_v23  ;;  %v4343_v2 = vmax.f32 %v4340_v24, 0.0 }
 0x5dd   : > { %4345 = vst [vmem:[%s379_s24] sm:$0xff] %v4342_v25 }
 0x5de   : > { %4346 = vst [vmem:[%s379_s24 + $0x8] sm:$0xff] %v4343_v2 }
 0x5df PF: > { %s20_s13 = sadd.s32 1, %s4937_s13  }
 0x5e0   : > { %p17_p4 = scmp.ge.s32.totalorder %s20_s13, 4  }
 0x5e2   :  { %19 = sbr.rel (!%p17_p4) target bundleno = 1 (0x1), region = 125 }

</bundles_post_ra>
